<compile_context>
chip_gen: v5e
topology: v5e:2x2
jax: 0.10.0
libtpu: 0.0.40
codegen_flags: <defaults>
</compile_context>

<pallas_src>
import math

import jax
import jax.numpy as jnp
from jax import lax
from jax.experimental import pallas as pl
from jax.experimental.pallas import tpu as pltpu

# --- quantization config (mirrors quant_table) ------------------------------
QUANT_BITS = 8          # total bits (sign + int + frac)
QUANT_INTLEN = 2        # integer bits ('quant_bp_coef': 2)


def _fixed_point_quantize(x, intlen=QUANT_INTLEN, bits=QUANT_BITS):
    """Symmetric signed fixed-point quantization: round-to-step + clamp."""
    frac_bits = bits - 1 - intlen
    step = 2.0 ** (-frac_bits)
    qmin = -(2.0 ** (bits - 1))
    qmax = 2.0 ** (bits - 1) - 1.0
    q = jnp.clip(jnp.round(x * (1.0 / step)), qmin, qmax)
    return q * step


def _round_up(x, m):
    return (x + m - 1) // m * m


# --- Pallas kernel: quantize halo tile + single fused K=9*C MXU matmul -------
def _make_kernel(TH, Wp, C, oc_on_lanes):
    K = 9 * C
    M = TH * Wp

    def kernel(x_ref, w_ref, b_ref, out_ref):
        # x_ref:   (TH+2, Wp+2, C) f32   zero-padded halo tile
        # w_ref:   (9*C, OCn)      bf16  K-fused weights (resident, const index)
        # b_ref:   (1, OCn)        f32   bias (resident)
        # out_ref: (TH, Wp, OCn) f32  if oc_on_lanes  else  (OCn, TH*Wp) f32

        # Quantize the halo tile once (VPU); values are exact in bf16.
        xq = _fixed_point_quantize(x_ref[...]).astype(jnp.bfloat16)

        # (TH, Wp, 9*C) activation slab: 9 shifted windows concatenated along
        # the contraction axis, (kh, kw, c) order matching the weight reshape.
        taps = [xq[kh:kh + TH, kw:kw + Wp, :]
                for kh in range(3) for kw in range(3)]
        xs = jnp.concatenate(taps, axis=-1).reshape(M, K)

        # One fused MXU matmul, K = 9*C, f32 accumulation; bias in-kernel.
        y = jnp.dot(xs, w_ref[...], preferred_element_type=jnp.float32)
        y = y + b_ref[...]                                   # (M, OCn)

        if oc_on_lanes:
            # OC >= 128: OC already lane-dense.
            out_ref[...] = y.reshape(TH, Wp, -1).astype(out_ref.dtype)
        else:
            # Small OC: store the small transposed tile -> lanes = TH*Wp
            # (multiple of 128), no OC->128 padding on the HBM writeback.
            out_ref[...] = jnp.transpose(y).astype(out_ref.dtype)

    return kernel


def conv_quant_forward(x_nchw, weight_oihw, bias, *, block_h=32):
    """ConvQuant.forward: quantize input, then 3x3 conv (stride 1, pad 1)."""
    N, C, H, W = x_nchw.shape
    OC, C_in, KH, KW = weight_oihw.shape
    assert (KH, KW) == (3, 3) and C_in == C

    # --- tiling ---------------------------------------------------------------
    Wp = _round_up(W, 8)                              # sublane-aligned width
    TH = min(block_h, _round_up(H, 8))                # output rows per grid step
    TH = _round_up(TH, 128 // math.gcd(Wp, 128))      # make TH*Wp % 128 == 0
    Hp = _round_up(H, TH)
    nT = Hp // TH
    M = TH * Wp

    oc_on_lanes = OC >= 128
    OCn = _round_up(OC, 128) if oc_on_lanes else _round_up(OC, 8)

    # --- host-side layout glue --------------------------------------------------
    # NCHW -> NHWC (C on lanes), zero pad: 1 halo row/col for the 3x3 conv plus
    # alignment padding (zeros quantize to zero, so padding pre-quantization is
    # equivalent).
    x_nhwc = jnp.transpose(x_nchw, (0, 2, 3, 1)).astype(jnp.float32)
    xpad = jnp.pad(x_nhwc, ((0, 0), (1, 1 + Hp - H), (1, 1 + Wp - W), (0, 0)))
    # Per-tile halo row windows so each grid step only needs O(TH) rows in VMEM.
    if nT == 1:
        x_tiles = xpad[:, None]                                  # (N, 1, TH+2, Wp+2, C)
    else:
        row_idx = (jnp.arange(nT) * TH)[:, None] + jnp.arange(TH + 2)[None, :]
        x_tiles = xpad[:, row_idx]                               # (N, nT, TH+2, Wp+2, C)

    # K-fused weights: (OC, C, 3, 3) -> (kh, kw, C, OC) -> (9*C, OCn) bf16.
    w = jnp.transpose(weight_oihw, (2, 3, 1, 0)).reshape(KH * KW * C, OC)
    w = jnp.pad(w, ((0, 0), (0, OCn - OC))).astype(jnp.bfloat16)
    b = jnp.pad(bias.astype(jnp.float32), (0, OCn - OC)).reshape(1, OCn)

    kernel = _make_kernel(TH, Wp, C, oc_on_lanes)

    if oc_on_lanes:
        out_shape = jax.ShapeDtypeStruct((N, nT, TH, Wp, OCn), jnp.float32)
        out_spec = pl.BlockSpec((None, None, TH, Wp, OCn),
                                lambda n, t: (n, t, 0, 0, 0))
    else:
        out_shape = jax.ShapeDtypeStruct((N, nT, OCn, M), jnp.float32)
        out_spec = pl.BlockSpec((None, None, OCn, M),
                                lambda n, t: (n, t, 0, 0))

    out = pl.pallas_call(
        kernel,
        out_shape=out_shape,
        grid_spec=pltpu.PrefetchScalarGridSpec(
            num_scalar_prefetch=0,
            grid=(N, nT),
            in_specs=[
                # Halo tile for this (batch, row-tile) grid point.
                pl.BlockSpec((None, None, TH + 2, Wp + 2, C),
                             lambda n, t: (n, t, 0, 0, 0)),
                # Weights / bias: constant block index -> resident in VMEM.
                pl.BlockSpec((KH * KW * C, OCn), lambda n, t: (0, 0)),
                pl.BlockSpec((1, OCn), lambda n, t: (0, 0)),
            ],
            out_specs=out_spec,
        ),
        compiler_params=pltpu.CompilerParams(
            # No cross-step scratch dependency -> both axes can shard across
            # TensorCores (v7x megacore); harmless on single-TC v5e/v6e.
            dimension_semantics=("parallel", "parallel"),
        ),
    )(x_tiles, w, b)

    if oc_on_lanes:
        out = out.reshape(N, Hp, Wp, OCn)[:, :H, :W, :OC]
        return jnp.transpose(out, (0, 3, 1, 2))                  # NHWC -> NCHW
    else:
        out = out.reshape(N, nT, OCn, TH, Wp)
        out = jnp.transpose(out, (0, 2, 1, 3, 4)).reshape(N, OCn, Hp, Wp)
        return out[:, :OC, :H, :W]                               # already NCHW


# --- pure-JAX reference (module semantics) -----------------------------------
def conv_quant_reference(x_nchw, weight_oihw, bias):
    xq = _fixed_point_quantize(x_nchw)
    out = lax.conv_general_dilated(
        xq.astype(jnp.float32), weight_oihw.astype(jnp.float32),
        window_strides=(1, 1), padding=((1, 1), (1, 1)),
        dimension_numbers=("NCHW", "OIHW", "NCHW"))
    return out + bias.reshape(1, -1, 1, 1)


if __name__ == "__main__":
    key = jax.random.PRNGKey(0)
    k_x, k_w, k_b = jax.random.split(key, 3)

    N, C, H, W = 2, 4, 16, 16
    OC, KH, KW = 8, 3, 3

    x = jax.random.normal(k_x, (N, C, H, W), dtype=jnp.float32) * 2.0
    # deterministic Kaiming-like init for the wrapped nn.Conv2d(4, 8, 3, padding=1)
    fan_in = C * KH * KW
    weight = jax.random.normal(k_w, (OC, C, KH, KW), dtype=jnp.float32) * (fan_in ** -0.5)
    bias = jax.random.normal(k_b, (OC,), dtype=jnp.float32) * 0.1

    fwd = jax.jit(conv_quant_forward)
    out = jax.block_until_ready(fwd(x, weight, bias))
    assert out.shape == (N, OC, H, W)

    # Tight check: reference with the same bf16-cast weights (identical numerics
    # up to f32 accumulation order).
    w_bf16 = weight.astype(jnp.bfloat16).astype(jnp.float32)
    ref_same = jax.block_until_ready(conv_quant_reference(x, w_bf16, bias))
    err_same = float(jnp.abs(out - ref_same).max())
    assert jnp.allclose(out, ref_same, atol=2e-3, rtol=2e-3), err_same

    # Loose check: exact-module (f32-weight) reference; the only deviation is
    # the bf16 weight cast inside the kernel (<~0.2% relative per weight).
    ref_f32 = jax.block_until_ready(conv_quant_reference(x, weight, bias))
    err_f32 = float(jnp.abs(out - ref_f32).max())
    assert jnp.allclose(out, ref_f32, atol=5e-2, rtol=5e-2), err_f32

    print("KERNEL_OK")
</pallas_src>

<mosaic_0001>
module attributes {stable_mosaic.version = 11 : i64} {
  func.func @kernel(%arg0: i32, %arg1: i32, %arg2: memref<1x1x18x18x4xf32, #tpu.memory_space<vmem>>, %arg3: memref<36x8xbf16, #tpu.memory_space<vmem>>, %arg4: memref<1x8xf32, #tpu.memory_space<vmem>>, %arg5: memref<1x1x8x256xf32, #tpu.memory_space<vmem>>) attributes {dimension_semantics = [#tpu.dimension_semantics<parallel>, #tpu.dimension_semantics<parallel>], iteration_bounds = array<i64: 2, 1>, scalar_prefetch = 0 : i64, scratch_operands = 0 : i64, tpu.core_type = #tpu.core_type<tc>, window_params = [{transform_indices = @transform_0, window_bounds = array<i64: 1, 1, 18, 18, 4>}, {pipeline_mode = #tpu.pipeline_mode<synchronous>, transform_indices = @transform_1, window_bounds = array<i64: 36, 8>}, {pipeline_mode = #tpu.pipeline_mode<synchronous>, transform_indices = @transform_2, window_bounds = array<i64: 1, 8>}, {transform_indices = @transform_3, window_bounds = array<i64: 1, 1, 8, 256>}]} {
    %c0 = arith.constant 0 : index
    %c0_0 = arith.constant 0 : index
    %c0_1 = arith.constant 0 : index
    %c0_2 = arith.constant 0 : index
    %c0_3 = arith.constant 0 : index
    %0 = vector.load %arg2[%c0, %c0_0, %c0_1, %c0_2, %c0_3] : memref<1x1x18x18x4xf32, #tpu.memory_space<vmem>>, vector<1x1x18x18x4xf32>
    %1 = vector.shape_cast %0 : vector<1x1x18x18x4xf32> to vector<18x18x4xf32>
    %cst = arith.constant 3.200000e+01 : f32
    %2 = vector.broadcast %cst : f32 to vector<18x18x4xf32>
    %3 = arith.mulf %1, %2 : vector<18x18x4xf32>
    %4 = math.roundeven %3 : vector<18x18x4xf32>
    %cst_4 = arith.constant -1.280000e+02 : f32
    %cst_5 = arith.constant 1.270000e+02 : f32
    %5 = vector.broadcast %cst_4 : f32 to vector<18x18x4xf32>
    %6 = arith.maximumf %5, %4 : vector<18x18x4xf32>
    %7 = vector.broadcast %cst_5 : f32 to vector<18x18x4xf32>
    %8 = arith.minimumf %7, %6 : vector<18x18x4xf32>
    %cst_6 = arith.constant 3.125000e-02 : f32
    %9 = vector.broadcast %cst_6 : f32 to vector<18x18x4xf32>
    %10 = arith.mulf %8, %9 : vector<18x18x4xf32>
    %11 = arith.truncf %10 : vector<18x18x4xf32> to vector<18x18x4xbf16>
    %12 = vector.extract_strided_slice %11 {offsets = [0, 0, 0], sizes = [16, 16, 4], strides = [1, 1, 1]} : vector<18x18x4xbf16> to vector<16x16x4xbf16>
    %13 = vector.extract_strided_slice %11 {offsets = [0, 1, 0], sizes = [16, 16, 4], strides = [1, 1, 1]} : vector<18x18x4xbf16> to vector<16x16x4xbf16>
    %14 = vector.extract_strided_slice %11 {offsets = [0, 2, 0], sizes = [16, 16, 4], strides = [1, 1, 1]} : vector<18x18x4xbf16> to vector<16x16x4xbf16>
    %15 = vector.extract_strided_slice %11 {offsets = [1, 0, 0], sizes = [16, 16, 4], strides = [1, 1, 1]} : vector<18x18x4xbf16> to vector<16x16x4xbf16>
    %16 = vector.extract_strided_slice %11 {offsets = [1, 1, 0], sizes = [16, 16, 4], strides = [1, 1, 1]} : vector<18x18x4xbf16> to vector<16x16x4xbf16>
    %17 = vector.extract_strided_slice %11 {offsets = [1, 2, 0], sizes = [16, 16, 4], strides = [1, 1, 1]} : vector<18x18x4xbf16> to vector<16x16x4xbf16>
    %18 = vector.extract_strided_slice %11 {offsets = [2, 0, 0], sizes = [16, 16, 4], strides = [1, 1, 1]} : vector<18x18x4xbf16> to vector<16x16x4xbf16>
    %19 = vector.extract_strided_slice %11 {offsets = [2, 1, 0], sizes = [16, 16, 4], strides = [1, 1, 1]} : vector<18x18x4xbf16> to vector<16x16x4xbf16>
    %20 = vector.extract_strided_slice %11 {offsets = [2, 2, 0], sizes = [16, 16, 4], strides = [1, 1, 1]} : vector<18x18x4xbf16> to vector<16x16x4xbf16>
    %21 = tpu.concatenate %12, %13, %14, %15, %16, %17, %18, %19, %20 in 2 : vector<16x16x4xbf16>, vector<16x16x4xbf16>, vector<16x16x4xbf16>, vector<16x16x4xbf16>, vector<16x16x4xbf16>, vector<16x16x4xbf16>, vector<16x16x4xbf16>, vector<16x16x4xbf16>, vector<16x16x4xbf16> -> vector<16x16x36xbf16>
    %22 = vector.shape_cast %21 : vector<16x16x36xbf16> to vector<256x36xbf16>
    %c0_7 = arith.constant 0 : index
    %c0_8 = arith.constant 0 : index
    %23 = vector.load %arg3[%c0_7, %c0_8] : memref<36x8xbf16, #tpu.memory_space<vmem>>, vector<36x8xbf16>
    %cst_9 = arith.constant dense<0.000000e+00> : vector<256x8xf32>
    %24 = tpu.matmul %22, %23, %cst_9 {dimension_numbers = #tpu.dot_dimension_numbers<[1], [0], [0], [1], [0, 0, 1, 1], [], []>} : vector<256x36xbf16>, vector<36x8xbf16>, vector<256x8xf32> -> vector<256x8xf32>
    %c0_10 = arith.constant 0 : index
    %c0_11 = arith.constant 0 : index
    %25 = vector.load %arg4[%c0_10, %c0_11] : memref<1x8xf32, #tpu.memory_space<vmem>>, vector<1x8xf32>
    %26 = vector.broadcast %25 : vector<1x8xf32> to vector<256x8xf32>
    %27 = arith.addf %24, %26 : vector<256x8xf32>
    %28 = tpu.transpose %27, [1, 0] : vector<256x8xf32> -> vector<8x256xf32>
    %c0_12 = arith.constant 0 : index
    %c0_13 = arith.constant 0 : index
    %c0_14 = arith.constant 0 : index
    %c0_15 = arith.constant 0 : index
    %29 = vector.load %arg5[%c0_12, %c0_13, %c0_14, %c0_15] : memref<1x1x8x256xf32, #tpu.memory_space<vmem>>, vector<1x1x8x256xf32>
    %30 = vector.shape_cast %29 : vector<1x1x8x256xf32> to vector<8x256xf32>
    %31 = vector.shape_cast %28 : vector<8x256xf32> to vector<1x1x8x256xf32>
    tpu.vector_store %arg5[%c0_12, %c0_13, %c0_14, %c0_15], %31 {strides = array<i32>} : memref<1x1x8x256xf32, #tpu.memory_space<vmem>>, vector<1x1x8x256xf32>,
    return
  }
  func.func @transform_0(%arg0: i32, %arg1: i32) -> (i32, i32, i32, i32, i32) {
    %c0_i32 = arith.constant 0 : i32
    %c0_i32_0 = arith.constant 0 : i32
    %c0_i32_1 = arith.constant 0 : i32
    %c0_i32_2 = arith.constant 0 : i32
    return %arg0, %arg1, %c0_i32, %c0_i32_0, %c0_i32_1 : i32, i32, i32, i32, i32
  }
  func.func @transform_1(%arg0: i32, %arg1: i32) -> (i32, i32) {
    %c0_i32 = arith.constant 0 : i32
    %c0_i32_0 = arith.constant 0 : i32
    %c0_i32_1 = arith.constant 0 : i32
    return %c0_i32, %c0_i32_0 : i32, i32
  }
  func.func @transform_2(%arg0: i32, %arg1: i32) -> (i32, i32) {
    %c0_i32 = arith.constant 0 : i32
    %c0_i32_0 = arith.constant 0 : i32
    %c0_i32_1 = arith.constant 0 : i32
    return %c0_i32, %c0_i32_0 : i32, i32
  }
  func.func @transform_3(%arg0: i32, %arg1: i32) -> (i32, i32, i32, i32) {
    %c0_i32 = arith.constant 0 : i32
    %c0_i32_0 = arith.constant 0 : i32
    %c0_i32_1 = arith.constant 0 : i32
    return %arg0, %arg1, %c0_i32, %c0_i32_0 : i32, i32, i32, i32
  }
}

</mosaic_0001>

<bundles_post_ra>
// kernel: conv_quant_forward.1
= control target key start
LH: loop header
LB: loop body
LE: loop exit
PB: predicated region body
PF: predicated region fallthrough
CT: control target
= control target key end

     0   :  { %s2394_s12 = smov 0   ;;  %s2396_s13 = smov 0   ;;  %s3747_s0 = inlined_call_operand.vmem [shape: f32[2,1,18,18,4], index: 0, kind: input, shape index: {}]   ;;  %s3748_s1 = inlined_call_operand.vmem [shape: bf16[36,8], index: 1, kind: input, shape index: {}]   ;;  %s3749_s2 = inlined_call_operand.vmem [shape: f32[1,8], index: 2, kind: input, shape index: {}]   ;;  %s3750_s3 = inlined_call_operand.vmem [shape: f32[2,1,8,256], index: 3, kind: output, shape index: {}]  }
   0x1   :  { %s2398_s14 = smov 0  }
   0x2 LB: > { %s25_s15 = sadd.s32 1, %s2360_s13  ;;  %p1834_p0 = scmp.ge.s32.totalorder %s2364_s14, 1  ;;  %s2364_s14 = sphi %s2398_s14, %s13_s14   ;;  %s2360_s13 = sphi %s2396_s13, %s3891_s13   ;;  %s2356_s12 = sphi %s2394_s12, %s3890_s12  }
   0x3   : > { %p27_p1 = scmp.ge.s32.totalorder %s25_s15, 2  ;;  %p157_p2 = scmp.lt.s32.totalorder %s2364_s14, 3 }
   0x5   : > { %s3893_s15 = smov (%p27_p1, %s25_s15), 0  ;;  %p158_p3 = pnand %p1834_p0, %p157_p2 }
   0x7   : > { %161 = sbr.rel (%p158_p3) target bundleno = 850 (0x352), region = 32 }
   0xc   : > { %p189_p4 = scmp.lt.s32.totalorder %s2356_s12, 1  ;;  %vm714_vm6 = vsmask.f32 7424  ;;  %s2366_s20 = smov 4  }
   0xd   : > { %s2367_s21 = smov 8   ;;  %s2368_s22 = smov 12  }
   0xe   : > { %s3895_s12 = smov (!%p189_p4, %s2356_s12), 1  ;;  %s2369_s23 = smov 16  }
   0xf   : > { %s1876_s16 = smul.u32 432, %s3895_s12  ;;  %s2370_s24 = smov 20  }
  0x10   : > { %s2371_s25 = smov 28   ;;  %s2372_s26 = smov 24  }
  0x11   : > { %s2418_s19 = scalar_lea.vmem %s3747_s0, %s1876_s16  ;;  %s2373_s27 = smov 32  }
  0x12   : > { %v220_v0 = vld [vmem:[%s2418_s19 + $0x60] sm:$0xff]  ;;  %v221_v1 = vld [vmem:[%s2418_s19 + $0x68] sm:$0xff]  ;;  %v222_v2 = vld [vmem:[%s2418_s19 + $0x70] sm:$0x3]  ;;  %s1864_s9 = sshll.u32 %s3895_s12, 4 }
  0x13   : > { %v274_v3 = vmul.f32 32.0, %v220_v0  ;;  %v275_v4 = vmul.f32 32.0, %v221_v1  ;;  %v276_v5 = vmul.f32 32.0, %v222_v2  ;;  %v214_v6 = vld [vmem:[%s2418_s19 + $0x30] sm:$0xff]  ;;  %v215_v7 = vld [vmem:[%s2418_s19 + $0x38] sm:$0xff]  ;;  %v208_v8 = vld [vmem:[%s2418_s19] sm:$0xff]  ;;  %s206_s16 = scalar_lea.vmem %s3750_s3, %s1864_s9 }
  0x14   : > { %v216_v9 = vld [vmem:[%s2418_s19 + $0x40] sm:$0x3]  ;;  %v268_v10 = vmul.f32 32.0, %v214_v6  ;;  %v269_v11 = vmul.f32 32.0, %v215_v7  ;;  %v2427_v12 = vmul.f32 32.0, %v208_v8  ;;  %v209_v53 = vld [vmem:[%s2418_s19 + $0x8] sm:$0xff] }
  0x15   : > { %v1973_v13 = vand.u32 2147483647, %v274_v3  ;;  %v1975_v14 = vcvt.f32.s32 %v274_v3  ;;  %v1978_v15 = vand.u32 2147483648, %v274_v3  ;;  %v1981_v16 = vand.u32 2147483647, %v275_v4 }
  0x16   : > { %v1983_v17 = vcvt.f32.s32 %v275_v4  ;;  %v1986_v18 = vand.u32 2147483648, %v275_v4  ;;  %v1989_v19 = vand.u32 2147483647, %v276_v5  ;;  %v1991_v20 = vcvt.f32.s32 %v276_v5  ;;  %v210_v62 = vld [vmem:[%s2418_s19 + $0x10] sm:$0x3] }
  0x17   : > { %vm2429_vm0 = vcmp.lt.f32.partialorder %v1973_v13, 8388608.0  ;;  %v1976_v22 = vcvt.s32.f32 %v1975_v14  ;;  %vm2433_vm1 = vcmp.lt.f32.partialorder %v1981_v16, 8388608.0  ;;  %v1994_v24 = vand.u32 2147483648, %v276_v5 }
  0x18   : > { %v1984_v25 = vcvt.s32.f32 %v1983_v17  ;;  %vm2437_vm2 = vcmp.lt.f32.partialorder %v1989_v19, 8388608.0  ;;  %v1992_v27 = vcvt.s32.f32 %v1991_v20  ;;  %v270_v28 = vmul.f32 32.0, %v216_v9 }
  0x19   : > { %v1977_v29 = vand.u32 2147483647, %v1976_v22  ;;  %v1925_v30 = vand.u32 2147483647, %v268_v10  ;;  %v1927_v31 = vcvt.f32.s32 %v268_v10  ;;  %v1930_v32 = vand.u32 2147483648, %v268_v10 }
  0x1a   : > { %v1985_v33 = vand.u32 2147483647, %v1984_v25  ;;  %v1993_v34 = vand.u32 2147483647, %v1992_v27  ;;  %v1933_v35 = vand.u32 2147483647, %v269_v11  ;;  %v1935_v36 = vcvt.f32.s32 %v269_v11 }
  0x1b   : > { %v1979_v37 = vor.u32 %v1978_v15, %v1977_v29  ;;  %vm2441_vm3 = vcmp.lt.f32.partialorder %v1925_v30, 8388608.0  ;;  %v1928_v39 = vcvt.s32.f32 %v1927_v31  ;;  %v1938_v40 = vand.u32 2147483648, %v269_v11 }
  0x1c   : > { %v1987_v41 = vor.u32 %v1986_v18, %v1985_v33  ;;  %v1995_v42 = vor.u32 %v1994_v24, %v1993_v34  ;;  %vm2445_vm4 = vcmp.lt.f32.partialorder %v1933_v35, 8388608.0  ;;  %v1936_v44 = vcvt.s32.f32 %v1935_v36 }
  0x1d   : > { %v1980_v45 = vsel %vm2429_vm0, %v1979_v37, %v274_v3  ;;  %v1929_v46 = vand.u32 2147483647, %v1928_v39  ;;  %v1941_v47 = vand.u32 2147483647, %v270_v28  ;;  %v1943_v48 = vcvt.f32.s32 %v270_v28 }
  0x1e   : > { %v1988_v49 = vsel %vm2433_vm1, %v1987_v41, %v275_v4  ;;  %v1996_v50 = vsel %vm2437_vm2, %v1995_v42, %v276_v5  ;;  %v382_v51 = vmax.f32 %v1980_v45, -128.0  ;;  %v1937_v52 = vand.u32 2147483647, %v1936_v44 }
  0x1f   : > { %v383_v54 = vmax.f32 %v1988_v49, -128.0  ;;  %v384_v55 = vmax.f32 %v1996_v50, -128.0  ;;  %v1931_v56 = vor.u32 %v1930_v32, %v1929_v46  ;;  %vm2456_vm5 = vcmp.lt.f32.partialorder %v1941_v47, 8388608.0 }
  0x20   : > { %v436_v58 = vmin.f32 %v382_v51, 127.0  ;;  %v1939_v59 = vor.u32 %v1938_v40, %v1937_v52  ;;  %v1944_v60 = vcvt.s32.f32 %v1943_v48  ;;  %v1946_v61 = vand.u32 2147483648, %v270_v28 }
  0x21   : > { %v437_v63 = vmin.f32 %v383_v54, 127.0  ;;  %v438_v0 = vmin.f32 %v384_v55, 127.0  ;;  %v1932_v1 = vsel %vm2441_vm3, %v1931_v56, %v268_v10  ;;  %v2463_v2 = vmul.f32 32.0, %v209_v53  ;;  %v223_v56 = vld [vmem:[%s2418_s19 + $0x78] sm:$0xff] }
  0x22   : > { %v490_v3 = vmul.f32 0.03125, %v436_v58  ;;  %v1940_v4 = vsel %vm2445_vm4, %v1939_v59, %v269_v11  ;;  %v1945_v5 = vand.u32 2147483647, %v1944_v60  ;;  %v376_v6 = vmax.f32 %v1932_v1, -128.0 }
  0x23   : > { %v491_v7 = vmul.f32 0.03125, %v437_v63  ;;  %v492_v8 = vmul.f32 0.03125, %v438_v0  ;;  %v377_v9 = vmax.f32 %v1940_v4, -128.0  ;;  %v2467_v13 = vmul.f32 32.0, %v210_v62 }
  0x24   : > { %v544_v14 = vpack.c.bf16 %v490_v3, %v490_v3  ;;  %v1947_v15 = vor.u32 %v1946_v61, %v1945_v5  ;;  %v430_v16 = vmin.f32 %v376_v6, 127.0  ;;  %v1877_v17 = vand.u32 2147483647, %v2427_v12  ;;  %v224_v61 = vld [vmem:[%s2418_s19 + $0x80] sm:$0xff] }
  0x25   : > { %v545_v18 = vpack.c.bf16 %v491_v7, %v491_v7  ;;  %v546_v10 = vpack.c.bf16 %v492_v8, %v492_v8  ;;  %v431_v19 = vmin.f32 %v377_v9, 127.0  ;;  %v1879_v20 = vcvt.f32.s32 %v2427_v12 }
  0x26   : > { %v626_v21 = vunpack.c.l.b16 %v544_v14  ;;  %v1948_v11 = vsel %vm2456_vm5, %v1947_v15, %v270_v28  ;;  %v484_v22 = vmul.f32 0.03125, %v430_v16  ;;  %vm2473_vm7 = vcmp.lt.f32.partialorder %v1877_v17, 8388608.0 }
  0x27   : > { %v627_v24 = vunpack.c.l.b16 %v545_v18  ;;  %v686_v25 = vunpack.c.l.b16 %v546_v10  ;;  %v378_v26 = vmax.f32 %v1948_v11, -128.0  ;;  %v485_v27 = vmul.f32 0.03125, %v431_v19 }
  0x28   : > { %v538_v29 = vpack.c.bf16 %v484_v22, %v484_v22  ;;  %v1880_v30 = vcvt.s32.f32 %v1879_v20  ;;  %v1882_v31 = vand.u32 2147483648, %v2427_v12  ;;  %v1885_v32 = vand.u32 2147483647, %v2463_v2 }
  0x29   : > { %v2479_v33 = vpack.c.b16 %v627_v24, %v626_v21  ;;  %v2481_v34 = vpack.c.b16 %v686_v25, %v686_v25  ;;  %v432_v28 = vmin.f32 %v378_v26, 127.0  ;;  %v539_v35 = vpack.c.bf16 %v485_v27, %v485_v27 }
  0x2a   : > { %v622_v36 = vunpack.c.l.b16 %v538_v29  ;;  %v1881_v37 = vand.u32 2147483647, %v1880_v30  ;;  %vm2483_vm8 = vcmp.lt.f32.partialorder %v1885_v32, 8388608.0  ;;  %v1887_v39 = vcvt.f32.s32 %v2463_v2 }
  0x2b   : > { %v764_v40 = vshrl.u32 %v2479_v33, 16  ;;  %v766_v41 = vshll.u32 %v2479_v33, 16  ;;  %v771_v42 = vshll.u32 %v2481_v34, 16  ;;  %v486_v43 = vmul.f32 0.03125, %v432_v28 }
  0x2c   : > { %v623_v44 = vunpack.c.l.b16 %v539_v35  ;;  %v1883_v45 = vor.u32 %v1882_v31, %v1881_v37  ;;  %v1888_v46 = vcvt.s32.f32 %v1887_v39  ;;  %v1890_v47 = vand.u32 2147483648, %v2463_v2  ;;  %v217_v37 = vld [vmem:[%s2418_s19 + $0x48] sm:$0xff] }
  0x2d   : > { %v768_v48 = vrot.slane %v766_v41, 1  ;;  %v773_v49 = vrot.slane %v771_v42, 1  ;;  %v540_v50 = vpack.c.bf16 %v486_v43, %v486_v43  ;;  %v1893_v51 = vand.u32 2147483647, %v2467_v13  ;;  %v218_v42 = vld [vmem:[%s2418_s19 + $0x50] sm:$0xff] }
  0x2e   : > { %v2493_v52 = vpack.c.b16 %v623_v44, %v622_v36  ;;  %v1884_v53 = vsel %vm2473_vm7, %v1883_v45, %v2427_v12  ;;  %v1889_v54 = vand.u32 2147483647, %v1888_v46  ;;  %v1895_v55 = vcvt.f32.s32 %v2467_v13  ;;  %v225_v12 = vld [vmem:[%s2418_s19 + $0x88] sm:$0x3] }
  0x2f   : > { %v769_v57 = vor.u32 %v768_v48, %v764_v40  ;;  %v684_v58 = vunpack.c.l.b16 %v540_v50  ;;  %vm2500_vm9 = vcmp.lt.f32.partialorder %v1893_v51, 8388608.0  ;;  %v1898_v60 = vand.u32 2147483648, %v2467_v13 }
  0x30   : > { %v740_v62 = vshrl.u32 %v2493_v52, 16  ;;  %v742_v63 = vshll.u32 %v2493_v52, 16  ;;  %v1891_v0 = vor.u32 %v1890_v47, %v1889_v54  ;;  %v1896_v1 = vcvt.s32.f32 %v1895_v55  ;;  %v219_v47 = vld [vmem:[%s2418_s19 + $0x58] sm:$0x3] }
  0x31   : > { %v2510_v3 = vsel %vm714_vm6, %v769_v57, %v773_v49  ;;  %v2512_v4 = vpack.c.b16 %v684_v58, %v684_v58  ;;  %v370_v5 = vmax.f32 %v1884_v53, -128.0  ;;  %v277_v6 = vmul.f32 32.0, %v223_v56 }
  0x32   : > { %3786 = vst [vmem:[#allocation2_spill] sm:$0xff] %v2510_v3  ;;  %915 = vrot.lane.b32.xlu2 %v2510_v3, %s2366_s20  ;;  %v744_v7 = vrot.slane %v742_v63, 1  ;;  %v1892_v8 = vsel %vm2483_vm8, %v1891_v0, %v2463_v2  ;;  %v1897_v9 = vand.u32 2147483647, %v1896_v1  ;;  %v2519_v14 = vmul.f32 32.0, %v224_v61 }
  0x33   : > { %v747_v15 = vshll.u32 %v2512_v4, 16  ;;  %v371_v16 = vmax.f32 %v1892_v8, -128.0  ;;  %v424_v17 = vmin.f32 %v370_v5, 127.0  ;;  %v2522_v18 = vmul.f32 32.0, %v225_v12 }
  0x34   : > { %v745_v10 = vor.u32 %v744_v7, %v740_v62  ;;  %v1899_v19 = vor.u32 %v1898_v60, %v1897_v9  ;;  %v1997_v20 = vand.u32 2147483647, %v277_v6  ;;  %v1999_v21 = vcvt.f32.s32 %v277_v6 }
  0x35   : > { %v749_v11 = vrot.slane %v747_v15, 1  ;;  %v425_v22 = vmin.f32 %v371_v16, 127.0  ;;  %v478_v23 = vmul.f32 0.03125, %v424_v17  ;;  %v2002_v24 = vand.u32 2147483648, %v277_v6 }
  0x36   : > { %v1900_v2 = vsel %vm2500_vm9, %v1899_v19, %v2467_v13  ;;  %vm2527_vm10 = vcmp.lt.f32.partialorder %v1997_v20, 8388608.0  ;;  %v2000_v26 = vcvt.s32.f32 %v1999_v21  ;;  %v2005_v27 = vand.u32 2147483647, %v2519_v14 }
  0x37   : > { %v2533_v29 = vsel %vm714_vm6, %v745_v10, %v749_v11  ;;  %v372_v30 = vmax.f32 %v1900_v2, -128.0  ;;  %v479_v31 = vmul.f32 0.03125, %v425_v22  ;;  %v532_v32 = vpack.c.bf16 %v478_v23, %v478_v23 }
  0x38   : > { %911 = vrot.lane.b32.xlu1 %v2533_v29, %s2366_s20  ;;  %v2001_v28 = vand.u32 2147483647, %v2000_v26  ;;  %vm2537_vm11 = vcmp.lt.f32.partialorder %v2005_v27, 8388608.0  ;;  %v2007_v35 = vcvt.f32.s32 %v2519_v14  ;;  %v2010_v36 = vand.u32 2147483648, %v2519_v14 }
  0x39   : > { %v426_v38 = vmin.f32 %v372_v30, 127.0  ;;  %v533_v39 = vpack.c.bf16 %v479_v31, %v479_v31  ;;  %v618_v40 = vunpack.c.l.b16 %v532_v32  ;;  %v2013_v41 = vand.u32 2147483647, %v2522_v18 }
  0x3a   : > { %v2003_v43 = vor.u32 %v2002_v24, %v2001_v28  ;;  %v2008_v44 = vcvt.s32.f32 %v2007_v35  ;;  %v2015_v45 = vcvt.f32.s32 %v2522_v18  ;;  %v2018_v46 = vand.u32 2147483648, %v2522_v18 }
  0x3b   : > { %v480_v48 = vmul.f32 0.03125, %v426_v38  ;;  %v619_v49 = vunpack.c.l.b16 %v533_v39  ;;  %vm2549_vm12 = vcmp.lt.f32.partialorder %v2013_v41, 8388608.0  ;;  %v271_v51 = vmul.f32 32.0, %v217_v37  ;;  %v211_v38 = vld [vmem:[%s2418_s19 + $0x18] sm:$0xff] }
  0x3c   : > { %v2004_v53 = vsel %vm2527_vm10, %v2003_v43, %v277_v6  ;;  %v2009_v54 = vand.u32 2147483647, %v2008_v44  ;;  %v2016_v55 = vcvt.s32.f32 %v2015_v45  ;;  %v2555_v56 = vmul.f32 32.0, %v218_v42  ;;  %v212_v43 = vld [vmem:[%s2418_s19 + $0x20] sm:$0xff]  ;;  %v213_v44 = vld [vmem:[%s2418_s19 + $0x28] sm:$0x3] }
  0x3d   : > { %v534_v57 = vpack.c.bf16 %v480_v48, %v480_v48  ;;  %v2557_v58 = vpack.c.b16 %v619_v49, %v618_v40  ;;  %v385_v59 = vmax.f32 %v2004_v53, -128.0  ;;  %v2559_v60 = vmul.f32 32.0, %v219_v47 }
  0x3e   : > { %v2011_v61 = vor.u32 %v2010_v36, %v2009_v54  ;;  %v2017_v62 = vand.u32 2147483647, %v2016_v55  ;;  %v1949_v63 = vand.u32 2147483647, %v271_v51  ;;  %v1951_v0 = vcvt.f32.s32 %v271_v51 }
  0x3f   : > { %v682_v1 = vunpack.c.l.b16 %v534_v57  ;;  %v716_v12 = vshrl.u32 %v2557_v58, 16  ;;  %v718_v5 = vshll.u32 %v2557_v58, 16  ;;  %v439_v6 = vmin.f32 %v385_v59, 127.0 }
  0x40   : > { %v2012_v7 = vsel %vm2537_vm11, %v2011_v61, %v2519_v14  ;;  %v2019_v8 = vor.u32 %v2018_v46, %v2017_v62  ;;  %vm2566_vm13 = vcmp.lt.f32.partialorder %v1949_v63, 8388608.0  ;;  %v1952_v15 = vcvt.s32.f32 %v1951_v0 }
  0x41   : > { %v2570_v16 = vpack.c.b16 %v682_v1, %v682_v1  ;;  %v720_v17 = vrot.slane %v718_v5, 1  ;;  %v386_v10 = vmax.f32 %v2012_v7, -128.0  ;;  %v493_v19 = vmul.f32 0.03125, %v439_v6 }
  0x42   : > { %v2020_v20 = vsel %vm2549_vm12, %v2019_v8, %v2522_v18  ;;  %v1953_v21 = vand.u32 2147483647, %v1952_v15  ;;  %v1954_v11 = vand.u32 2147483648, %v271_v51  ;;  %v1957_v22 = vand.u32 2147483647, %v2555_v56 }
  0x43   : > { %v721_v14 = vor.u32 %v720_v17, %v716_v12  ;;  %v723_v23 = vshll.u32 %v2570_v16, 16  ;;  %v387_v24 = vmax.f32 %v2020_v20, -128.0  ;;  %v440_v2 = vmin.f32 %v386_v10, 127.0 }
  0x44   : > { %v547_v25 = vpack.c.bf16 %v493_v19, %v493_v19  ;;  %v1955_v26 = vor.u32 %v1954_v11, %v1953_v21  ;;  %vm2577_vm14 = vcmp.lt.f32.partialorder %v1957_v22, 8388608.0  ;;  %v1959_v18 = vcvt.f32.s32 %v2555_v56 }
  0x45   : > { %v725_v30 = vrot.slane %v723_v23, 1  ;;  %v441_v31 = vmin.f32 %v387_v24, 127.0  ;;  %v494_v32 = vmul.f32 0.03125, %v440_v2  ;;  %v1962_v28 = vand.u32 2147483648, %v2555_v56 }
  0x46   : > { %v628_v13 = vunpack.c.l.b16 %v547_v25  ;;  %v1956_v35 = vsel %vm2566_vm13, %v1955_v26, %v271_v51  ;;  %v1960_v36 = vcvt.s32.f32 %v1959_v18  ;;  %v1965_v37 = vand.u32 2147483647, %v2559_v60 }
  0x47   : > { %v726_v39 = vsel %vm714_vm6, %v721_v14, %v725_v30  ;;  %v495_v40 = vmul.f32 0.03125, %v441_v31  ;;  %v548_v41 = vpack.c.bf16 %v494_v32, %v494_v32  ;;  %v1967_v42 = vcvt.f32.s32 %v2559_v60 }
  0x48   : > { %907 = vrot.lane.b32.xlu0 %v726_v39, %s2366_s20  ;;  %v1961_v45 = vand.u32 2147483647, %v1960_v36  ;;  %vm2592_vm15 = vcmp.lt.f32.partialorder %v1965_v37, 8388608.0  ;;  %v1970_v47 = vand.u32 2147483648, %v2559_v60  ;;  %v379_v48 = vmax.f32 %v1956_v35, -128.0  ;;  %v232_v37 = vld [vmem:[%s2418_s19 + $0xc0] sm:$0xff] }
  0x49   : > { %v549_v49 = vpack.c.bf16 %v495_v40, %v495_v40  ;;  %v629_v50 = vunpack.c.l.b16 %v548_v41  ;;  %v1968_v51 = vcvt.s32.f32 %v1967_v42  ;;  %v265_v53 = vmul.f32 32.0, %v211_v38  ;;  %v233_v38 = vld [vmem:[%s2418_s19 + $0xc8] sm:$0xff] }
  0x4a   : > { %v1963_v54 = vor.u32 %v1962_v28, %v1961_v45  ;;  %v433_v55 = vmin.f32 %v379_v48, 127.0  ;;  %v2597_v57 = vmul.f32 32.0, %v212_v43  ;;  %v2599_v59 = vmul.f32 32.0, %v213_v44  ;;  %v234_v43 = vld [vmem:[%s2418_s19 + $0xd0] sm:$0x3] }
  0x4b   : > { %v2601_v61 = vpack.c.b16 %v629_v50, %v628_v13  ;;  %v687_v62 = vunpack.c.l.b16 %v549_v49  ;;  %v1969_v63 = vand.u32 2147483647, %v1968_v51  ;;  %v1901_v0 = vand.u32 2147483647, %v265_v53  ;;  %v231_v45 = vld [vmem:[%s2418_s19 + $0xb8] sm:$0x3] }
  0x4c   : > { %v1964_v1 = vsel %vm2577_vm14, %v1963_v54, %v2555_v56  ;;  %v487_v12 = vmul.f32 0.03125, %v433_v55  ;;  %v1903_v5 = vcvt.f32.s32 %v265_v53  ;;  %v1906_v6 = vand.u32 2147483648, %v265_v53 }
  0x4d   : > { %v2606_v7 = vpack.c.b16 %v687_v62, %v687_v62  ;;  %v776_v8 = vshrl.u32 %v2601_v61, 16  ;;  %v778_v9 = vshll.u32 %v2601_v61, 16  ;;  %v1971_v15 = vor.u32 %v1970_v47, %v1969_v63 }
  0x4e   : > { %v380_v17 = vmax.f32 %v1964_v1, -128.0  ;;  %v541_v10 = vpack.c.bf16 %v487_v12, %v487_v12  ;;  %vm2610_vm0 = vcmp.lt.f32.partialorder %v1901_v0, 8388608.0  ;;  %v1904_v20 = vcvt.s32.f32 %v1903_v5 }
  0x4f   : > { %v780_v21 = vrot.slane %v778_v9, 1  ;;  %v783_v56 = vshll.u32 %v2606_v7, 16  ;;  %v1972_v11 = vsel %vm2592_vm15, %v1971_v15, %v2559_v60  ;;  %v1909_v22 = vand.u32 2147483647, %v2597_v57 }
  0x50   : > { %v381_v14 = vmax.f32 %v1972_v11, -128.0  ;;  %v434_v23 = vmin.f32 %v380_v17, 127.0  ;;  %v624_v24 = vunpack.c.l.b16 %v541_v10  ;;  %v1905_v2 = vand.u32 2147483647, %v1904_v20 }
  0x51   : > { %v781_v25 = vor.u32 %v780_v21, %v776_v8  ;;  %v785_v26 = vrot.slane %v783_v56, 1  ;;  %vm2619_vm1 = vcmp.lt.f32.partialorder %v1909_v22, 8388608.0  ;;  %v1911_v18 = vcvt.f32.s32 %v2597_v57 }
  0x52   : > { %v435_v30 = vmin.f32 %v381_v14, 127.0  ;;  %v488_v31 = vmul.f32 0.03125, %v434_v23  ;;  %v1907_v60 = vor.u32 %v1906_v6, %v1905_v2  ;;  %v1914_v32 = vand.u32 2147483648, %v2597_v57 }
  0x53   : > { %v2626_v28 = vsel %vm714_vm6, %v781_v25, %v785_v26  ;;  %v1912_v13 = vcvt.s32.f32 %v1911_v18  ;;  %v1917_v35 = vand.u32 2147483647, %v2599_v59  ;;  %v1919_v36 = vcvt.f32.s32 %v2599_v59 }
  0x54   : > { %3803 = vst [vmem:[#allocation3_spill] sm:$0xff] %v2626_v28  ;;  %917 = vrot.lane.b32.xlu2 %v2626_v28, %s2366_s20  ;;  %v489_v39 = vmul.f32 0.03125, %v435_v30  ;;  %v542_v40 = vpack.c.bf16 %v488_v31, %v488_v31  ;;  %v1908_v41 = vsel %vm2610_vm0, %v1907_v60, %v265_v53  ;;  %v1922_v42 = vand.u32 2147483648, %v2599_v59 }
  0x55   : > { %v1913_v44 = vand.u32 2147483647, %v1912_v13  ;;  %vm2638_vm2 = vcmp.lt.f32.partialorder %v1917_v35, 8388608.0  ;;  %v1920_v46 = vcvt.s32.f32 %v1919_v36  ;;  %v373_v47 = vmax.f32 %v1908_v41, -128.0 }
  0x56   : > { %v543_v48 = vpack.c.bf16 %v489_v39, %v489_v39  ;;  %v625_v49 = vunpack.c.l.b16 %v542_v40  ;;  %v286_v50 = vmul.f32 32.0, %v232_v37  ;;  %v2642_v51 = vmul.f32 32.0, %v233_v38  ;;  %v229_v39 = vld [vmem:[%s2418_s19 + $0xa8] sm:$0xff]  ;;  %v230_v40 = vld [vmem:[%s2418_s19 + $0xb0] sm:$0xff] }
  0x57   : > { %v1915_v54 = vor.u32 %v1914_v32, %v1913_v44  ;;  %v1921_v55 = vand.u32 2147483647, %v1920_v46  ;;  %v427_v62 = vmin.f32 %v373_v47, 127.0  ;;  %v2644_v63 = vmul.f32 32.0, %v234_v43 }
  0x58   : > { %v2646_v53 = vpack.c.b16 %v625_v49, %v624_v24  ;;  %v685_v0 = vunpack.c.l.b16 %v543_v48  ;;  %v2069_v1 = vand.u32 2147483647, %v286_v50  ;;  %v2071_v12 = vcvt.f32.s32 %v286_v50 }
  0x59   : > { %v1916_v5 = vsel %vm2619_vm1, %v1915_v54, %v2597_v57  ;;  %v1923_v6 = vor.u32 %v1922_v42, %v1921_v55  ;;  %v481_v8 = vmul.f32 0.03125, %v427_v62  ;;  %v2074_v9 = vand.u32 2147483648, %v286_v50 }
  0x5a   : > { %v2651_v15 = vpack.c.b16 %v685_v0, %v685_v0  ;;  %v752_v17 = vshrl.u32 %v2646_v53, 16  ;;  %v754_v10 = vshll.u32 %v2646_v53, 16  ;;  %v374_v19 = vmax.f32 %v1916_v5, -128.0 }
  0x5b   : > { %v1924_v20 = vsel %vm2638_vm2, %v1923_v6, %v2599_v59  ;;  %v535_v21 = vpack.c.bf16 %v481_v8, %v481_v8  ;;  %vm2658_vm3 = vcmp.lt.f32.partialorder %v2069_v1, 8388608.0  ;;  %v2072_v57 = vcvt.s32.f32 %v2071_v12 }
  0x5c   : > { %v756_v11 = vrot.slane %v754_v10, 1  ;;  %v759_v22 = vshll.u32 %v2651_v15, 16  ;;  %v375_v14 = vmax.f32 %v1924_v20, -128.0  ;;  %v428_v23 = vmin.f32 %v374_v19, 127.0 }
  0x5d   : > { %v620_v24 = vunpack.c.l.b16 %v535_v21  ;;  %v2073_v2 = vand.u32 2147483647, %v2072_v57  ;;  %v2077_v25 = vand.u32 2147483647, %v2642_v51  ;;  %v2079_v26 = vcvt.f32.s32 %v2642_v51 }
  0x5e   : > { %v757_v59 = vor.u32 %v756_v11, %v752_v17  ;;  %v761_v27 = vrot.slane %v759_v22, 1  ;;  %v429_v18 = vmin.f32 %v375_v14, 127.0  ;;  %v482_v30 = vmul.f32 0.03125, %v428_v23 }
  0x5f   : > { %v2075_v31 = vor.u32 %v2074_v9, %v2073_v2  ;;  %vm2665_vm4 = vcmp.lt.f32.partialorder %v2077_v25, 8388608.0  ;;  %v2080_v32 = vcvt.s32.f32 %v2079_v26  ;;  %v2082_v13 = vand.u32 2147483648, %v2642_v51 }
  0x60   : > { %v2671_v35 = vsel %vm714_vm6, %v757_v59, %v761_v27  ;;  %v483_v36 = vmul.f32 0.03125, %v429_v18  ;;  %v536_v37 = vpack.c.bf16 %v482_v30, %v482_v30  ;;  %v2085_v38 = vand.u32 2147483647, %v2644_v63 }
  0x61   : > { %913 = vrot.lane.b32.xlu1 %v2671_v35, %s2366_s20  ;;  %v2076_v41 = vsel %vm2658_vm3, %v2075_v31, %v286_v50  ;;  %v2081_v42 = vand.u32 2147483647, %v2080_v32  ;;  %v2087_v43 = vcvt.f32.s32 %v2644_v63  ;;  %v2090_v44 = vand.u32 2147483648, %v2644_v63 }
  0x62   : > { %v537_v46 = vpack.c.bf16 %v483_v36, %v483_v36  ;;  %v621_v47 = vunpack.c.l.b16 %v536_v37  ;;  %vm2683_vm5 = vcmp.lt.f32.partialorder %v2085_v38, 8388608.0  ;;  %v394_v49 = vmax.f32 %v2076_v41, -128.0 }
  0x63   : > { %v2083_v54 = vor.u32 %v2082_v13, %v2081_v42  ;;  %v2088_v55 = vcvt.s32.f32 %v2087_v43  ;;  %v283_v62 = vmul.f32 32.0, %v229_v39  ;;  %v2687_v0 = vmul.f32 32.0, %v230_v40  ;;  %v226_v40 = vld [vmem:[%s2418_s19 + $0x90] sm:$0xff] }
  0x64   : > { %v2689_v1 = vpack.c.b16 %v621_v47, %v620_v24  ;;  %v683_v50 = vunpack.c.l.b16 %v537_v46  ;;  %v448_v12 = vmin.f32 %v394_v49, 127.0  ;;  %v2691_v5 = vmul.f32 32.0, %v231_v45  ;;  %v227_v45 = vld [vmem:[%s2418_s19 + $0x98] sm:$0xff] }
  0x65   : > { %v2084_v6 = vsel %vm2665_vm4, %v2083_v54, %v2642_v51  ;;  %v2089_v8 = vand.u32 2147483647, %v2088_v55  ;;  %v2045_v9 = vand.u32 2147483647, %v283_v62  ;;  %v2047_v17 = vcvt.f32.s32 %v283_v62  ;;  %v228_v54 = vld [vmem:[%s2418_s19 + $0xa0] sm:$0x3] }
  0x66   : > { %v2696_v10 = vpack.c.b16 %v683_v50, %v683_v50  ;;  %v728_v19 = vshrl.u32 %v2689_v1, 16  ;;  %v730_v20 = vshll.u32 %v2689_v1, 16  ;;  %v395_v21 = vmax.f32 %v2084_v6, -128.0 }
  0x67   : > { %v2091_v56 = vor.u32 %v2090_v44, %v2089_v8  ;;  %v502_v57 = vmul.f32 0.03125, %v448_v12  ;;  %vm2700_vm7 = vcmp.lt.f32.partialorder %v2045_v9, 8388608.0  ;;  %v2048_v22 = vcvt.s32.f32 %v2047_v17 }
  0x68   : > { %v732_v14 = vrot.slane %v730_v20, 1  ;;  %v735_v51 = vshll.u32 %v2696_v10, 16  ;;  %v449_v23 = vmin.f32 %v395_v21, 127.0  ;;  %v2050_v24 = vand.u32 2147483648, %v283_v62 }
  0x69   : > { %v2092_v2 = vsel %vm2683_vm5, %v2091_v56, %v2644_v63  ;;  %v556_v25 = vpack.c.bf16 %v502_v57, %v502_v57  ;;  %v2049_v26 = vand.u32 2147483647, %v2048_v22  ;;  %v2053_v59 = vand.u32 2147483647, %v2687_v0 }
  0x6a   : > { %v733_v27 = vor.u32 %v732_v14, %v728_v19  ;;  %v737_v18 = vrot.slane %v735_v51, 1  ;;  %v396_v30 = vmax.f32 %v2092_v2, -128.0  ;;  %v503_v31 = vmul.f32 0.03125, %v449_v23 }
  0x6b   : > { %v634_v60 = vunpack.c.l.b16 %v556_v25  ;;  %v2051_v32 = vor.u32 %v2050_v24, %v2049_v26  ;;  %vm2709_vm8 = vcmp.lt.f32.partialorder %v2053_v59, 8388608.0  ;;  %v2055_v36 = vcvt.f32.s32 %v2687_v0 }
  0x6c   : > { %v2715_v63 = vsel %vm714_vm6, %v733_v27, %v737_v18  ;;  %v450_v37 = vmin.f32 %v396_v30, 127.0  ;;  %v557_v38 = vpack.c.bf16 %v503_v31, %v503_v31  ;;  %v2058_v39 = vand.u32 2147483648, %v2687_v0 }
  0x6d   : > { %909 = vrot.lane.b32.xlu0 %v2715_v63, %s2366_s20  ;;  %v2052_v41 = vsel %vm2700_vm7, %v2051_v32, %v283_v62  ;;  %v2056_v42 = vcvt.s32.f32 %v2055_v36  ;;  %v2061_v43 = vand.u32 2147483647, %v2691_v5  ;;  %v2063_v44 = vcvt.f32.s32 %v2691_v5 }
  0x6e   : > { %v504_v46 = vmul.f32 0.03125, %v450_v37  ;;  %v635_v47 = vunpack.c.l.b16 %v557_v38  ;;  %v2066_v48 = vand.u32 2147483648, %v2691_v5  ;;  %v391_v49 = vmax.f32 %v2052_v41, -128.0 }
  0x6f   : > { %v2057_v55 = vand.u32 2147483647, %v2056_v42  ;;  %vm2728_vm9 = vcmp.lt.f32.partialorder %v2061_v43, 8388608.0  ;;  %v2064_v12 = vcvt.s32.f32 %v2063_v44  ;;  %v280_v6 = vmul.f32 32.0, %v226_v40 }
  0x70   : > { %v558_v62 = vpack.c.bf16 %v504_v46, %v504_v46  ;;  %v2732_v8 = vpack.c.b16 %v635_v47, %v634_v60  ;;  %v445_v9 = vmin.f32 %v391_v49, 127.0  ;;  %v2734_v17 = vmul.f32 32.0, %v227_v45 }
  0x71   : > { %v2059_v19 = vor.u32 %v2058_v39, %v2057_v55  ;;  %v2065_v20 = vand.u32 2147483647, %v2064_v12  ;;  %v2736_v21 = vmul.f32 32.0, %v228_v54  ;;  %v2021_v56 = vand.u32 2147483647, %v280_v6  ;;  %v242_v12 = vld [vmem:[%s2418_s19 + $0x110] sm:$0xff] }
  0x72   : > { %v690_v57 = vunpack.c.l.b16 %v558_v62  ;;  %v812_v11 = vshrl.u32 %v2732_v8, 16  ;;  %v814_v22 = vshll.u32 %v2732_v8, 16  ;;  %v499_v14 = vmul.f32 0.03125, %v445_v9  ;;  %v243_v62 = vld [vmem:[%s2418_s19 + $0x118] sm:$0x3] }
  0x73   : > { %v2060_v51 = vsel %vm2709_vm8, %v2059_v19, %v2687_v0  ;;  %v2067_v23 = vor.u32 %v2066_v48, %v2065_v20  ;;  %vm2743_vm10 = vcmp.lt.f32.partialorder %v2021_v56, 8388608.0  ;;  %v2023_v2 = vcvt.f32.s32 %v280_v6  ;;  %v241_v48 = vld [vmem:[%s2418_s19 + $0x108] sm:$0xff] }
  0x74   : > { %v2747_v25 = vpack.c.b16 %v690_v57, %v690_v57  ;;  %v816_v26 = vrot.slane %v814_v22, 1  ;;  %v392_v59 = vmax.f32 %v2060_v51, -128.0  ;;  %v553_v27 = vpack.c.bf16 %v499_v14, %v499_v14 }
  0x75   : > { %v2068_v18 = vsel %vm2728_vm9, %v2067_v23, %v2691_v5  ;;  %v2024_v30 = vcvt.s32.f32 %v2023_v2  ;;  %v2026_v31 = vand.u32 2147483648, %v280_v6  ;;  %v2029_v60 = vand.u32 2147483647, %v2734_v17 }
  0x76   : > { %v817_v0 = vor.u32 %v816_v26, %v812_v11  ;;  %v819_v32 = vshll.u32 %v2747_v25, 16  ;;  %v393_v13 = vmax.f32 %v2068_v18, -128.0  ;;  %v446_v36 = vmin.f32 %v392_v59, 127.0 }
  0x77   : > { %v632_v37 = vunpack.c.l.b16 %v553_v27  ;;  %v2025_v38 = vand.u32 2147483647, %v2024_v30  ;;  %vm2754_vm11 = vcmp.lt.f32.partialorder %v2029_v60, 8388608.0  ;;  %v2031_v5 = vcvt.f32.s32 %v2734_v17 }
  0x78   : > { %v821_v40 = vrot.slane %v819_v32, 1  ;;  %v447_v41 = vmin.f32 %v393_v13, 127.0  ;;  %v500_v42 = vmul.f32 0.03125, %v446_v36  ;;  %v2034_v43 = vand.u32 2147483648, %v2734_v17 }
  0x79   : > { %v2027_v44 = vor.u32 %v2026_v31, %v2025_v38  ;;  %v2032_v45 = vcvt.s32.f32 %v2031_v5  ;;  %v2037_v46 = vand.u32 2147483647, %v2736_v21  ;;  %v2039_v47 = vcvt.f32.s32 %v2736_v21 }
  0x7a   : > { %v2764_v49 = vsel %vm714_vm6, %v817_v0, %v821_v40  ;;  %v501_v54 = vmul.f32 0.03125, %v447_v41  ;;  %v554_v55 = vpack.c.bf16 %v500_v42, %v500_v42  ;;  %v2042_v50 = vand.u32 2147483648, %v2736_v21 }
  0x7b   : > { %3822 = vst [vmem:[#allocation4_spill] sm:$0xff] %v2764_v49  ;;  %923 = vrot.lane.b32.xlu2 %v2764_v49, %s2366_s20  ;;  %v2028_v9 = vsel %vm2743_vm10, %v2027_v44, %v280_v6  ;;  %v2033_v19 = vand.u32 2147483647, %v2032_v45  ;;  %vm2773_vm12 = vcmp.lt.f32.partialorder %v2037_v46, 8388608.0  ;;  %v2040_v56 = vcvt.s32.f32 %v2039_v47 }
  0x7c   : > { %v555_v57 = vpack.c.bf16 %v501_v54, %v501_v54  ;;  %v633_v11 = vunpack.c.l.b16 %v554_v55  ;;  %v388_v22 = vmax.f32 %v2028_v9, -128.0  ;;  %v295_v14 = vmul.f32 32.0, %v241_v48 }
  0x7d   : > { %v2035_v51 = vor.u32 %v2034_v43, %v2033_v19  ;;  %v2041_v23 = vand.u32 2147483647, %v2040_v56  ;;  %v2777_v2 = vmul.f32 32.0, %v242_v12  ;;  %v2779_v26 = vmul.f32 32.0, %v243_v62  ;;  %v238_v56 = vld [vmem:[%s2418_s19 + $0xf0] sm:$0xff] }
  0x7e   : > { %v2781_v59 = vpack.c.b16 %v633_v11, %v632_v37  ;;  %v689_v24 = vunpack.c.l.b16 %v555_v57  ;;  %v442_v6 = vmin.f32 %v388_v22, 127.0  ;;  %v2141_v27 = vand.u32 2147483647, %v295_v14 }
  0x7f   : > { %v2036_v18 = vsel %vm2754_vm11, %v2035_v51, %v2734_v17  ;;  %v2043_v30 = vor.u32 %v2042_v50, %v2041_v23  ;;  %v2143_v31 = vcvt.f32.s32 %v295_v14  ;;  %v2146_v60 = vand.u32 2147483648, %v295_v14 }
  0x80   : > { %v2786_v0 = vpack.c.b16 %v689_v24, %v689_v24  ;;  %v800_v32 = vshrl.u32 %v2781_v59, 16  ;;  %v802_v13 = vshll.u32 %v2781_v59, 16  ;;  %v389_v36 = vmax.f32 %v2036_v18, -128.0  ;;  %v239_v18 = vld [vmem:[%s2418_s19 + $0xf8] sm:$0xff] }
  0x81   : > { %v2044_v37 = vsel %vm2773_vm12, %v2043_v30, %v2736_v21  ;;  %v496_v38 = vmul.f32 0.03125, %v442_v6  ;;  %vm2793_vm13 = vcmp.lt.f32.partialorder %v2141_v27, 8388608.0  ;;  %v2144_v17 = vcvt.s32.f32 %v2143_v31  ;;  %v240_v30 = vld [vmem:[%s2418_s19 + $0x100] sm:$0x3] }
  0x82   : > { %v804_v39 = vrot.slane %v802_v13, 1  ;;  %v807_v40 = vshll.u32 %v2786_v0, 16  ;;  %v390_v41 = vmax.f32 %v2044_v37, -128.0  ;;  %v443_v42 = vmin.f32 %v389_v36, 127.0 }
  0x83   : > { %v550_v43 = vpack.c.bf16 %v496_v38, %v496_v38  ;;  %v2145_v44 = vand.u32 2147483647, %v2144_v17  ;;  %v2149_v45 = vand.u32 2147483647, %v2777_v2  ;;  %v2151_v46 = vcvt.f32.s32 %v2777_v2 }
  0x84   : > { %v805_v47 = vor.u32 %v804_v39, %v800_v32  ;;  %v809_v21 = vrot.slane %v807_v40, 1  ;;  %v444_v48 = vmin.f32 %v390_v41, 127.0  ;;  %v497_v54 = vmul.f32 0.03125, %v443_v42 }
  0x85   : > { %v630_v55 = vunpack.c.l.b16 %v550_v43  ;;  %v2147_v50 = vor.u32 %v2146_v60, %v2145_v44  ;;  %v2152_v12 = vcvt.s32.f32 %v2151_v46  ;;  %v2154_v20 = vand.u32 2147483648, %v2777_v2 }
  0x86   : > { %v2801_v62 = vsel %vm714_vm6, %v805_v47, %v809_v21  ;;  %v498_v9 = vmul.f32 0.03125, %v444_v48  ;;  %v551_v19 = vpack.c.bf16 %v497_v54, %v497_v54  ;;  %v2157_v22 = vand.u32 2147483647, %v2779_v26 }
  0x87   : > { %3827 = vst [vmem:[#allocation5_spill] sm:$0xff] %v2801_v62  ;;  %921 = vrot.lane.b32.xlu1 %v2801_v62, %s2366_s20  ;;  %v2148_v57 = vsel %vm2793_vm13, %v2147_v50, %v295_v14  ;;  %v2153_v11 = vand.u32 2147483647, %v2152_v12  ;;  %v2159_v51 = vcvt.f32.s32 %v2779_v26  ;;  %vm2811_vm14 = vcmp.lt.f32.partialorder %v2149_v45, 8388608.0 }
  0x88   : > { %v552_v23 = vpack.c.bf16 %v498_v9, %v498_v9  ;;  %v631_v24 = vunpack.c.l.b16 %v551_v19  ;;  %v403_v27 = vmax.f32 %v2148_v57, -128.0  ;;  %v2162_v32 = vand.u32 2147483648, %v2779_v26 }
  0x89   : > { %v2155_v31 = vor.u32 %v2154_v20, %v2153_v11  ;;  %v2160_v60 = vcvt.s32.f32 %v2159_v51  ;;  %v292_v13 = vmul.f32 32.0, %v238_v56  ;;  %vm2820_vm15 = vcmp.lt.f32.partialorder %v2157_v22, 8388608.0 }
  0x8a   : > { %v2818_v14 = vpack.c.b16 %v631_v24, %v630_v55  ;;  %v688_v36 = vunpack.c.l.b16 %v552_v23  ;;  %v457_v38 = vmin.f32 %v403_v27, 127.0  ;;  %v2827_v39 = vmul.f32 32.0, %v239_v18 }
  0x8b   : > { %v2156_v5 = vsel %vm2811_vm14, %v2155_v31, %v2777_v2  ;;  %v2161_v17 = vand.u32 2147483647, %v2160_v60  ;;  %v2829_v40 = vmul.f32 32.0, %v240_v30  ;;  %v2117_v47 = vand.u32 2147483647, %v292_v13  ;;  %v235_v30 = vld [vmem:[%s2418_s19 + $0xd8] sm:$0xff] }
  0x8c   : > { %v2831_v41 = vpack.c.b16 %v688_v36, %v688_v36  ;;  %v788_v42 = vshrl.u32 %v2818_v14, 16  ;;  %v790_v43 = vshll.u32 %v2818_v14, 16  ;;  %v404_v44 = vmax.f32 %v2156_v5, -128.0 }
  0x8d   : > { %v2163_v45 = vor.u32 %v2162_v32, %v2161_v17  ;;  %v511_v46 = vmul.f32 0.03125, %v457_v38  ;;  %v2119_v21 = vcvt.f32.s32 %v292_v13  ;;  %v2122_v55 = vand.u32 2147483648, %v292_v13 }
  0x8e   : > { %v792_v48 = vrot.slane %v790_v43, 1  ;;  %v795_v54 = vshll.u32 %v2831_v41, 16  ;;  %v458_v2 = vmin.f32 %v404_v44, 127.0  ;;  %v2125_v19 = vand.u32 2147483647, %v2827_v39 }
  0x8f   : > { %v2164_v50 = vsel %vm2820_vm15, %v2163_v45, %v2779_v26  ;;  %v565_v12 = vpack.c.bf16 %v511_v46, %v511_v46  ;;  %v2120_v9 = vcvt.s32.f32 %v2119_v21  ;;  %vm2840_vm0 = vcmp.lt.f32.partialorder %v2117_v47, 8388608.0 }
  0x90   : > { %v793_v20 = vor.u32 %v792_v48, %v788_v42  ;;  %v797_v56 = vrot.slane %v795_v54, 1  ;;  %v405_v57 = vmax.f32 %v2164_v50, -128.0  ;;  %v512_v11 = vmul.f32 0.03125, %v458_v2  ;;  %v236_v42 = vld [vmem:[%s2418_s19 + $0xe0] sm:$0xff]  ;;  %v237_v2 = vld [vmem:[%s2418_s19 + $0xe8] sm:$0x3] }
  0x91   : > { %v640_v22 = vunpack.c.l.b16 %v565_v12  ;;  %v2121_v23 = vand.u32 2147483647, %v2120_v9  ;;  %v2127_v24 = vcvt.f32.s32 %v2827_v39  ;;  %v2130_v18 = vand.u32 2147483648, %v2827_v39 }
  0x92   : > { %v2846_v26 = vsel %vm714_vm6, %v793_v20, %v797_v56  ;;  %v459_v6 = vmin.f32 %v405_v57, 127.0  ;;  %v566_v27 = vpack.c.bf16 %v512_v11, %v512_v11  ;;  %v2133_v32 = vand.u32 2147483647, %v2829_v40 }
  0x93   : > { %919 = vrot.lane.b32.xlu0 %v2846_v26, %s2366_s20  ;;  %v2123_v31 = vor.u32 %v2122_v55, %v2121_v23  ;;  %v2128_v60 = vcvt.s32.f32 %v2127_v24  ;;  %v2135_v36 = vcvt.f32.s32 %v2829_v40  ;;  %vm2854_vm1 = vcmp.lt.f32.partialorder %v2125_v19, 8388608.0 }
  0x94   : > { %v513_v37 = vmul.f32 0.03125, %v459_v6  ;;  %v641_v38 = vunpack.c.l.b16 %v566_v27  ;;  %v2138_v17 = vand.u32 2147483648, %v2829_v40  ;;  %v289_v46 = vmul.f32 32.0, %v235_v30 }
  0x95   : > { %v2124_v43 = vsel %vm2840_vm0, %v2123_v31, %v292_v13  ;;  %v2129_v44 = vand.u32 2147483647, %v2128_v60  ;;  %v2136_v45 = vcvt.s32.f32 %v2135_v36  ;;  %vm2864_vm2 = vcmp.lt.f32.partialorder %v2133_v32, 8388608.0 }
  0x96   : > { %v567_v47 = vpack.c.bf16 %v513_v37, %v513_v37  ;;  %v2862_v21 = vpack.c.b16 %v641_v38, %v640_v22  ;;  %v400_v54 = vmax.f32 %v2124_v43, -128.0  ;;  %v2869_v12 = vmul.f32 32.0, %v236_v42 }
  0x97   : > { %v2131_v55 = vor.u32 %v2130_v18, %v2129_v44  ;;  %v2137_v50 = vand.u32 2147483647, %v2136_v45  ;;  %v2093_v9 = vand.u32 2147483647, %v289_v46  ;;  %v2876_v22 = vmul.f32 32.0, %v237_v2 }
  0x98   : > { %v693_v19 = vunpack.c.l.b16 %v567_v47  ;;  %v848_v13 = vshrl.u32 %v2862_v21, 16  ;;  %v850_v20 = vshll.u32 %v2862_v21, 16  ;;  %v454_v56 = vmin.f32 %v400_v54, 127.0 }
  0x99   : > { %v2132_v57 = vsel %vm2854_vm1, %v2131_v55, %v2827_v39  ;;  %v2139_v11 = vor.u32 %v2138_v17, %v2137_v50  ;;  %v2095_v51 = vcvt.f32.s32 %v289_v46  ;;  %vm2883_vm3 = vcmp.lt.f32.partialorder %v2093_v9, 8388608.0 }
  0x9a   : > { %v2878_v23 = vpack.c.b16 %v693_v19, %v693_v19  ;;  %v852_v24 = vrot.slane %v850_v20, 1  ;;  %v401_v6 = vmax.f32 %v2132_v57, -128.0  ;;  %v508_v27 = vmul.f32 0.03125, %v454_v56  ;;  %v251_v20 = vld [vmem:[%s2418_s19 + $0x158] sm:$0xff] }
  0x9b   : > { %v2140_v18 = vsel %vm2864_vm2, %v2139_v11, %v2829_v40  ;;  %v2096_v31 = vcvt.s32.f32 %v2095_v51  ;;  %v2098_v60 = vand.u32 2147483648, %v289_v46  ;;  %v2101_v17 = vand.u32 2147483647, %v2869_v12 }
  0x9c   : > { %v853_v39 = vor.u32 %v852_v24, %v848_v13  ;;  %v855_v32 = vshll.u32 %v2878_v23, 16  ;;  %v402_v36 = vmax.f32 %v2140_v18, -128.0  ;;  %v455_v37 = vmin.f32 %v401_v6, 127.0  ;;  %v250_v13 = vld [vmem:[%s2418_s19 + $0x150] sm:$0xff] }
  0x9d   : > { %v562_v38 = vpack.c.bf16 %v508_v27, %v508_v27  ;;  %v2097_v5 = vand.u32 2147483647, %v2096_v31  ;;  %v2103_v42 = vcvt.f32.s32 %v2869_v12  ;;  %v2106_v45 = vand.u32 2147483648, %v2869_v12  ;;  %v252_v31 = vld [vmem:[%s2418_s19 + $0x160] sm:$0x3] }
  0x9e   : > { %v857_v40 = vrot.slane %v855_v32, 1  ;;  %v456_v43 = vmin.f32 %v402_v36, 127.0  ;;  %v509_v44 = vmul.f32 0.03125, %v455_v37  ;;  %v2109_v2 = vand.u32 2147483647, %v2876_v22 }
  0x9f   : > { %v638_v47 = vunpack.c.l.b16 %v562_v38  ;;  %v2099_v48 = vor.u32 %v2098_v60, %v2097_v5  ;;  %v2104_v54 = vcvt.s32.f32 %v2103_v42  ;;  %v2111_v19 = vcvt.f32.s32 %v2876_v22 }
  0xa0   : > { %v2893_v55 = vsel %vm714_vm6, %v853_v39, %v857_v40  ;;  %v510_v50 = vmul.f32 0.03125, %v456_v43  ;;  %v563_v9 = vpack.c.bf16 %v509_v44, %v509_v44  ;;  %vm2902_vm4 = vcmp.lt.f32.partialorder %v2101_v17, 8388608.0 }
  0xa1   : > { %929 = vrot.lane.b32.xlu2 %v2893_v55, %s2366_s20  ;;  %v2100_v56 = vsel %vm2883_vm3, %v2099_v48, %v289_v46  ;;  %v2105_v11 = vand.u32 2147483647, %v2104_v54  ;;  %v2114_v51 = vand.u32 2147483648, %v2876_v22  ;;  %v2112_v27 = vcvt.s32.f32 %v2111_v19 }
  0xa2   : > { %v564_v24 = vpack.c.bf16 %v510_v50, %v510_v50  ;;  %v639_v6 = vunpack.c.l.b16 %v563_v9  ;;  %v397_v18 = vmax.f32 %v2100_v56, -128.0  ;;  %vm2908_vm5 = vcmp.lt.f32.partialorder %v2109_v2, 8388608.0 }
  0xa3   : > { %v2107_v60 = vor.u32 %v2106_v45, %v2105_v11  ;;  %v304_v32 = vmul.f32 32.0, %v250_v13  ;;  %v2912_v30 = vmul.f32 32.0, %v251_v20  ;;  %v2113_v37 = vand.u32 2147483647, %v2112_v27 }
  0xa4   : > { %v2914_v46 = vpack.c.b16 %v639_v6, %v638_v47  ;;  %v692_v36 = vunpack.c.l.b16 %v564_v24  ;;  %v451_v38 = vmin.f32 %v397_v18, 127.0  ;;  %v2919_v17 = vmul.f32 32.0, %v252_v31 }
  0xa5   : > { %v2108_v5 = vsel %vm2902_vm4, %v2107_v60, %v2869_v12  ;;  %v2213_v42 = vand.u32 2147483647, %v304_v32  ;;  %v2215_v40 = vcvt.f32.s32 %v304_v32  ;;  %v2115_v48 = vor.u32 %v2114_v51, %v2113_v37 }
  0xa6   : > { %v2921_v43 = vpack.c.b16 %v692_v36, %v692_v36  ;;  %v836_v44 = vshrl.u32 %v2914_v46, 16  ;;  %v838_v45 = vshll.u32 %v2914_v46, 16  ;;  %v398_v47 = vmax.f32 %v2108_v5, -128.0  ;;  %v247_v5 = vld [vmem:[%s2418_s19 + $0x138] sm:$0xff] }
  0xa7   : > { %v505_v54 = vmul.f32 0.03125, %v451_v38  ;;  %v2216_v2 = vcvt.s32.f32 %v2215_v40  ;;  %v2218_v50 = vand.u32 2147483648, %v304_v32  ;;  %v2116_v12 = vsel %vm2908_vm5, %v2115_v48, %v2876_v22  ;;  %v248_v48 = vld [vmem:[%s2418_s19 + $0x140] sm:$0xff] }
  0xa8   : > { %v840_v9 = vrot.slane %v838_v45, 1  ;;  %v843_v19 = vshll.u32 %v2921_v43, 16  ;;  %vm2929_vm7 = vcmp.lt.f32.partialorder %v2213_v42, 8388608.0  ;;  %v399_v20 = vmax.f32 %v2116_v12, -128.0 }
  0xa9   : > { %v452_v56 = vmin.f32 %v398_v47, 127.0  ;;  %v559_v57 = vpack.c.bf16 %v505_v54, %v505_v54  ;;  %v2217_v11 = vand.u32 2147483647, %v2216_v2  ;;  %v2221_v6 = vand.u32 2147483647, %v2912_v30 }
  0xaa   : > { %v841_v51 = vor.u32 %v840_v9, %v836_v44  ;;  %v845_v24 = vrot.slane %v843_v19, 1  ;;  %v2223_v27 = vcvt.f32.s32 %v2912_v30  ;;  %v453_v18 = vmin.f32 %v399_v20, 127.0  ;;  %v249_v20 = vld [vmem:[%s2418_s19 + $0x148] sm:$0x3] }
  0xab   : > { %v506_v31 = vmul.f32 0.03125, %v452_v56  ;;  %v636_v60 = vunpack.c.l.b16 %v559_v57  ;;  %v2219_v22 = vor.u32 %v2218_v50, %v2217_v11  ;;  %v2226_v37 = vand.u32 2147483648, %v2912_v30 }
  0xac   : > { %v2936_v39 = vsel %vm714_vm6, %v841_v51, %v845_v24  ;;  %v2224_v36 = vcvt.s32.f32 %v2223_v27  ;;  %v2229_v38 = vand.u32 2147483647, %v2919_v17  ;;  %v507_v42 = vmul.f32 0.03125, %v453_v18 }
  0xad   : > { %3846 = vst [vmem:[#allocation6_spill] sm:$0xff] %v2936_v39  ;;  %927 = vrot.lane.b32.xlu1 %v2936_v39, %s2366_s20  ;;  %v560_v40 = vpack.c.bf16 %v506_v31, %v506_v31  ;;  %v2220_v44 = vsel %vm2929_vm7, %v2219_v22, %v304_v32  ;;  %v2231_v45 = vcvt.f32.s32 %v2919_v17  ;;  %vm2947_vm8 = vcmp.lt.f32.partialorder %v2221_v6, 8388608.0 }
  0xae   : > { %v2225_v54 = vand.u32 2147483647, %v2224_v36  ;;  %v2234_v2 = vand.u32 2147483648, %v2919_v17  ;;  %v412_v50 = vmax.f32 %v2220_v44, -128.0  ;;  %v561_v9 = vpack.c.bf16 %v507_v42, %v507_v42 }
  0xaf   : > { %v637_v19 = vunpack.c.l.b16 %v560_v40  ;;  %v2232_v12 = vcvt.s32.f32 %v2231_v45  ;;  %v301_v56 = vmul.f32 32.0, %v247_v5  ;;  %vm2953_vm9 = vcmp.lt.f32.partialorder %v2229_v38, 8388608.0 }
  0xb0   : > { %v2227_v57 = vor.u32 %v2226_v37, %v2225_v54  ;;  %v466_v32 = vmin.f32 %v412_v50, 127.0  ;;  %v2957_v11 = vmul.f32 32.0, %v248_v48  ;;  %v691_v24 = vunpack.c.l.b16 %v561_v9 }
  0xb1   : > { %v2959_v51 = vpack.c.b16 %v637_v19, %v636_v60  ;;  %v2233_v6 = vand.u32 2147483647, %v2232_v12  ;;  %v2189_v27 = vand.u32 2147483647, %v301_v56  ;;  %v2964_v22 = vmul.f32 32.0, %v249_v20 }
  0xb2   : > { %v2228_v18 = vsel %vm2947_vm8, %v2227_v57, %v2912_v30  ;;  %v520_v31 = vmul.f32 0.03125, %v466_v32  ;;  %v2191_v36 = vcvt.f32.s32 %v301_v56  ;;  %v2966_v37 = vpack.c.b16 %v691_v24, %v691_v24 }
  0xb3   : > { %v824_v38 = vshrl.u32 %v2959_v51, 16  ;;  %v826_v5 = vshll.u32 %v2959_v51, 16  ;;  %v2235_v42 = vor.u32 %v2234_v2, %v2233_v6  ;;  %v413_v60 = vmax.f32 %v2228_v18, -128.0 }
  0xb4   : > { %v574_v40 = vpack.c.bf16 %v520_v31, %v520_v31  ;;  %v2192_v44 = vcvt.s32.f32 %v2191_v36  ;;  %v2194_v45 = vand.u32 2147483648, %v301_v56  ;;  %v831_v54 = vshll.u32 %v2966_v37, 16 }
  0xb5   : > { %v828_v48 = vrot.slane %v826_v5, 1  ;;  %v2236_v30 = vsel %vm2953_vm9, %v2235_v42, %v2919_v17  ;;  %vm2974_vm10 = vcmp.lt.f32.partialorder %v2189_v27, 8388608.0  ;;  %v467_v9 = vmin.f32 %v413_v60, 127.0 }
  0xb6   : > { %v414_v50 = vmax.f32 %v2236_v30, -128.0  ;;  %v2193_v19 = vand.u32 2147483647, %v2192_v44  ;;  %v2197_v2 = vand.u32 2147483647, %v2957_v11  ;;  %v833_v20 = vrot.slane %v831_v54, 1 }
  0xb7   : > { %v829_v12 = vor.u32 %v828_v48, %v824_v38  ;;  %v646_v57 = vunpack.c.l.b16 %v574_v40  ;;  %v2199_v32 = vcvt.f32.s32 %v2957_v11  ;;  %v521_v6 = vmul.f32 0.03125, %v467_v9  ;;  %v244_v38 = vld [vmem:[%s2418_s19 + $0x120] sm:$0xff]  ;;  %v245_v44 = vld [vmem:[%s2418_s19 + $0x128] sm:$0xff] }
  0xb8   : > { %v468_v24 = vmin.f32 %v414_v50, 127.0  ;;  %v2195_v13 = vor.u32 %v2194_v45, %v2193_v19  ;;  %v2202_v17 = vand.u32 2147483648, %v2957_v11  ;;  %v2205_v31 = vand.u32 2147483647, %v2964_v22  ;;  %v246_v50 = vld [vmem:[%s2418_s19 + $0x130] sm:$0x3] }
  0xb9   : > { %v2982_v27 = vsel %vm714_vm6, %v829_v12, %v833_v20  ;;  %v2200_v18 = vcvt.s32.f32 %v2199_v32  ;;  %v2207_v36 = vcvt.f32.s32 %v2964_v22  ;;  %v575_v42 = vpack.c.bf16 %v521_v6, %v521_v6 }
  0xba   : > { %3853 = vst [vmem:[#allocation7_spill] sm:$0xff] %v2982_v27  ;;  %925 = vrot.lane.b32.xlu0 %v2982_v27, %s2366_s20  ;;  %v522_v5 = vmul.f32 0.03125, %v468_v24  ;;  %v2196_v60 = vsel %vm2974_vm10, %v2195_v13, %v301_v56  ;;  %vm2991_vm11 = vcmp.lt.f32.partialorder %v2197_v2, 8388608.0  ;;  %v2210_v54 = vand.u32 2147483648, %v2964_v22 }
  0xbb   : > { %v2201_v45 = vand.u32 2147483647, %v2200_v18  ;;  %v2208_v48 = vcvt.s32.f32 %v2207_v36  ;;  %v409_v30 = vmax.f32 %v2196_v60, -128.0  ;;  %v647_v19 = vunpack.c.l.b16 %v575_v42 }
  0xbc   : > { %v576_v9 = vpack.c.bf16 %v522_v5, %v522_v5  ;;  %vm2998_vm12 = vcmp.lt.f32.partialorder %v2205_v31, 8388608.0  ;;  %v298_v20 = vmul.f32 32.0, %v244_v38  ;;  %v299_v32 = vmul.f32 32.0, %v245_v44 }
  0xbd   : > { %v2203_v47 = vor.u32 %v2202_v17, %v2201_v45  ;;  %v2209_v56 = vand.u32 2147483647, %v2208_v48  ;;  %v463_v2 = vmin.f32 %v409_v30, 127.0  ;;  %v3002_v24 = vpack.c.b16 %v647_v19, %v646_v57 }
  0xbe   : > { %v696_v6 = vunpack.c.l.b16 %v576_v9  ;;  %v3004_v13 = vmul.f32 32.0, %v246_v50  ;;  %v2167_v18 = vcvt.f32.s32 %v298_v20  ;;  %v2165_v42 = vand.u32 2147483647, %v298_v20 }
  0xbf   : > { %v2204_v36 = vsel %vm2991_vm11, %v2203_v47, %v2957_v11  ;;  %v2211_v5 = vor.u32 %v2210_v54, %v2209_v56  ;;  %v517_v31 = vmul.f32 0.03125, %v463_v2  ;;  %v884_v17 = vshrl.u32 %v3002_v24, 16 }
  0xc0   : > { %v3009_v60 = vpack.c.b16 %v696_v6, %v696_v6  ;;  %v886_v38 = vshll.u32 %v3002_v24, 16  ;;  %v410_v44 = vmax.f32 %v2204_v36, -128.0  ;;  %v2168_v48 = vcvt.s32.f32 %v2167_v18 }
  0xc1   : > { %v2212_v57 = vsel %vm2998_vm12, %v2211_v5, %v2964_v22  ;;  %v571_v45 = vpack.c.bf16 %v517_v31, %v517_v31  ;;  %v2170_v30 = vand.u32 2147483648, %v298_v20  ;;  %vm3017_vm13 = vcmp.lt.f32.partialorder %v2165_v42, 8388608.0 }
  0xc2   : > { %v888_v50 = vrot.slane %v886_v38, 1  ;;  %v891_v11 = vshll.u32 %v3009_v60, 16  ;;  %v411_v40 = vmax.f32 %v2212_v57, -128.0  ;;  %v464_v54 = vmin.f32 %v410_v44, 127.0 }
  0xc3   : > { %v2169_v19 = vand.u32 2147483647, %v2168_v48  ;;  %v2173_v47 = vand.u32 2147483647, %v299_v32  ;;  %v2175_v56 = vcvt.f32.s32 %v299_v32  ;;  %v644_v22 = vunpack.c.l.b16 %v571_v45 }
  0xc4   : > { %v889_v2 = vor.u32 %v888_v50, %v884_v17  ;;  %v893_v6 = vrot.slane %v891_v11, 1  ;;  %v465_v36 = vmin.f32 %v411_v40, 127.0  ;;  %v518_v12 = vmul.f32 0.03125, %v464_v54 }
  0xc5   : > { %v2171_v5 = vor.u32 %v2170_v30, %v2169_v19  ;;  %v2176_v18 = vcvt.s32.f32 %v2175_v56  ;;  %v2178_v31 = vand.u32 2147483648, %v299_v32  ;;  %vm3024_vm14 = vcmp.lt.f32.partialorder %v2173_v47, 8388608.0 }
  0xc6   : > { %v3022_v38 = vsel %vm714_vm6, %v889_v2, %v893_v6  ;;  %v519_v57 = vmul.f32 0.03125, %v465_v36  ;;  %v572_v44 = vpack.c.bf16 %v518_v12, %v518_v12  ;;  %v2181_v45 = vand.u32 2147483647, %v3004_v13 }
  0xc7   : > { %935 = vrot.lane.b32.xlu2 %v3022_v38, %s2366_s20  ;;  %v2172_v17 = vsel %vm3017_vm13, %v2171_v5, %v298_v20  ;;  %v2177_v48 = vand.u32 2147483647, %v2176_v18  ;;  %v2183_v30 = vcvt.f32.s32 %v3004_v13  ;;  %v2186_v40 = vand.u32 2147483648, %v3004_v13 }
  0xc8   : > { %v573_v50 = vpack.c.bf16 %v519_v57, %v519_v57  ;;  %v645_v11 = vunpack.c.l.b16 %v572_v44  ;;  %v406_v54 = vmax.f32 %v2172_v17, -128.0  ;;  %vm939_vm15 = vcmask 1046528  }
  0xc9   : > { %v2179_v19 = vor.u32 %v2178_v31, %v2177_v48  ;;  %v2184_v47 = vcvt.s32.f32 %v2183_v30  ;;  %v943_v56 = vrot.slane %v2689_v1, 1  ;;  %v944_v6 = vrot.slane %v2696_v10, 1  ;;  %v253_v31 = vld [vmem:[%s2418_s19 + $0x168] sm:$0xff]  ;;  %v254_v10 = vld [vmem:[%s2418_s19 + $0x170] sm:$0xff] }
  0xca   : > { %v3036_v2 = vpack.c.b16 %v645_v11, %v644_v22  ;;  %v695_v20 = vunpack.c.l.b16 %v573_v50  ;;  %v460_v9 = vmin.f32 %v406_v54, 127.0  ;;  %vm3041_vm0 = vcmp.lt.f32.partialorder %v2181_v45, 8388608.0  ;;  %v255_v54 = vld [vmem:[%s2418_s19 + $0x178] sm:$0x3] }
  0xcb   : > { %v2180_v36 = vsel %vm3024_vm14, %v2179_v19, %v299_v32  ;;  %v2185_v5 = vand.u32 2147483647, %v2184_v47  ;;  %v940_v18 = vrot.slane %v2557_v58, 1  ;;  %v3053_v32 = vsel %vm939_vm15, %v943_v56, %v944_v6 }
  0xcc   : > { %v3047_v57 = vpack.c.b16 %v695_v20, %v695_v20  ;;  %v872_v22 = vshrl.u32 %v3036_v2, 16  ;;  %v874_v44 = vshll.u32 %v3036_v2, 16  ;;  %v407_v17 = vmax.f32 %v2180_v36, -128.0  ;;  %3864 = vst [vmem:[#allocation8_spill] sm:$0xff] %v3053_v32 }
  0xcd   : > { %v2187_v48 = vor.u32 %v2186_v40, %v2185_v5  ;;  %v514_v42 = vmul.f32 0.03125, %v460_v9  ;;  %v941_v45 = vrot.slane %v2570_v16, 1  ;;  %v307_v19 = vmul.f32 32.0, %v253_v31 }
  0xce   : > { %v876_v30 = vrot.slane %v874_v44, 1  ;;  %v879_v50 = vshll.u32 %v3047_v57, 16  ;;  %v461_v11 = vmin.f32 %v407_v17, 127.0  ;;  %v308_v40 = vmul.f32 32.0, %v254_v10 }
  0xcf   : > { %v2188_v47 = vsel %vm3041_vm0, %v2187_v48, %v3004_v13  ;;  %v568_v20 = vpack.c.bf16 %v514_v42, %v514_v42  ;;  %990 = vrot.lane.b32.xlu2 %v3053_v32, %s2367_s21  ;;  %v942_v36 = vsel %vm939_vm15, %v940_v18, %v941_v45  ;;  %v309_v5 = vmul.f32 32.0, %v255_v54 }
  0xd0   : > { %v877_v56 = vor.u32 %v876_v30, %v872_v22  ;;  %v881_v9 = vrot.slane %v879_v50, 1  ;;  %v408_v6 = vmax.f32 %v2188_v47, -128.0  ;;  %v515_v16 = vmul.f32 0.03125, %v461_v11 }
  0xd1   : > { %v2237_v44 = vand.u32 2147483647, %v307_v19  ;;  %v2239_v17 = vcvt.f32.s32 %v307_v19  ;;  %v642_v48 = vunpack.c.l.b16 %v568_v20  ;;  %v2242_v10 = vand.u32 2147483648, %v307_v19 }
  0xd2   : > { %v3065_v31 = vsel %vm714_vm6, %v877_v56, %v881_v9  ;;  %v462_v12 = vmin.f32 %v408_v6, 127.0  ;;  %v569_v13 = vpack.c.bf16 %v515_v16, %v515_v16  ;;  %v2245_v22 = vand.u32 2147483647, %v308_v40 }
  0xd3   : > { %3865 = vst [vmem:[#allocation9_spill] sm:$0xff] %v3065_v31  ;;  %933 = vrot.lane.b32.xlu1 %v3065_v31, %s2366_s20  ;;  %v2240_v42 = vcvt.s32.f32 %v2239_v17  ;;  %v2247_v30 = vcvt.f32.s32 %v308_v40  ;;  %vm3069_vm1 = vcmp.lt.f32.partialorder %v2237_v44, 8388608.0  ;;  %v2250_v45 = vand.u32 2147483648, %v308_v40 }
  0xd4   : > { %v516_v50 = vmul.f32 0.03125, %v462_v12  ;;  %v643_v11 = vunpack.c.l.b16 %v569_v13  ;;  %v2253_v56 = vand.u32 2147483647, %v309_v5  ;;  %v2255_v9 = vcvt.f32.s32 %v309_v5 }
  0xd5   : > { %v2241_v54 = vand.u32 2147483647, %v2240_v42  ;;  %v2248_v47 = vcvt.s32.f32 %v2247_v30  ;;  %v2258_v16 = vand.u32 2147483648, %v309_v5  ;;  %v952_v17 = vrot.slane %v2479_v33, 1 }
  0xd6   : > { %v570_v6 = vpack.c.bf16 %v516_v50, %v516_v50  ;;  %v3073_v20 = vpack.c.b16 %v643_v11, %v642_v48  ;;  %v2256_v32 = vcvt.s32.f32 %v2255_v9  ;;  %v953_v12 = vrot.slane %v2481_v34, 1 }
  0xd7   : > { %v2243_v31 = vor.u32 %v2242_v10, %v2241_v54  ;;  %v2249_v39 = vand.u32 2147483647, %v2248_v47  ;;  %vm3079_vm2 = vcmp.lt.f32.partialorder %v2245_v22, 8388608.0  ;;  %vm2254_vm3 = vcmp.lt.f32.partialorder %v2253_v56, 8388608.0 }
  0xd8   : > { %v694_v44 = vunpack.c.l.b16 %v570_v6  ;;  %v860_v13 = vshrl.u32 %v3073_v20, 16  ;;  %v862_v62 = vshll.u32 %v3073_v20, 16  ;;  %v2257_v50 = vand.u32 2147483647, %v2256_v32 }
  0xd9   : > { %v2244_v48 = vsel %vm3069_vm1, %v2243_v31, %v307_v19  ;;  %v2251_v30 = vor.u32 %v2250_v45, %v2249_v39  ;;  %v3086_v10 = vsel %vm939_vm15, %v952_v17, %v953_v12  ;;  %v949_v39 = vrot.slane %v2646_v53, 1 }
  0xda   : > { %v3088_v11 = vpack.c.b16 %v694_v44, %v694_v44  ;;  %v864_v34 = vrot.slane %v862_v62, 1  ;;  %v415_v54 = vmax.f32 %v2244_v48, -128.0  ;;  %996 = vrot.lane.b32.xlu2 %v3086_v10, %s2367_s21  ;;  %v2259_v18 = vor.u32 %v2258_v16, %v2257_v50 }
  0xdb   : > { %988 = vrot.lane.b32.xlu1 %v942_v36, %s2367_s21  ;;  %v2252_v22 = vsel %vm3079_vm2, %v2251_v30, %v308_v40  ;;  %v950_v32 = vrot.slane %v2651_v15, 1  ;;  %v961_v56 = vrot.slane %v2781_v59, 1  ;;  %v962_v40 = vrot.slane %v2786_v0, 1 }
  0xdc   : > { %v865_v19 = vor.u32 %v864_v34, %v860_v13  ;;  %v867_v31 = vshll.u32 %v3088_v11, 16  ;;  %v416_v45 = vmax.f32 %v2252_v22, -128.0  ;;  %v469_v62 = vmin.f32 %v415_v54, 127.0 }
  0xdd   : > { %v2260_v47 = vsel %vm2254_vm3, %v2259_v18, %v309_v5  ;;  %v3100_v12 = vsel %vm939_vm15, %v949_v39, %v950_v32  ;;  %v3109_v5 = vsel %vm939_vm15, %v961_v56, %v962_v40  ;;  %v970_v0 = vrot.slane %v2914_v46, 1 }
  0xde   : > { %v869_v9 = vrot.slane %v867_v31, 1  ;;  %v417_v6 = vmax.f32 %v2260_v47, -128.0  ;;  %v470_v17 = vmin.f32 %v416_v45, 127.0  ;;  %v523_v36 = vmul.f32 0.03125, %v469_v62 }
  0xdf   : > { %v971_v50 = vrot.slane %v2921_v43, 1  ;;  %v958_v22 = vrot.slane %v2818_v14, 1  ;;  %v959_v18 = vrot.slane %v2831_v41, 1  ;;  %v979_v41 = vrot.slane %v3036_v2, 1 }
  0xe0   : > { %v3104_v16 = vsel %vm714_vm6, %v865_v19, %v869_v9  ;;  %v471_v15 = vmin.f32 %v417_v6, 127.0  ;;  %v524_v44 = vmul.f32 0.03125, %v470_v17  ;;  %v577_v13 = vpack.c.bf16 %v523_v36, %v523_v36 }
  0xe1   : > { %931 = vrot.lane.b32.xlu0 %v3104_v16, %s2366_s20  ;;  %v3122_v19 = vsel %vm939_vm15, %v970_v0, %v971_v50  ;;  %v3127_v47 = vsel %vm939_vm15, %v958_v22, %v959_v18  ;;  %v980_v9 = vrot.slane %v3047_v57, 1  ;;  %v967_v36 = vrot.slane %v2959_v51, 1 }
  0xe2   : > { %v525_v42 = vmul.f32 0.03125, %v471_v15  ;;  %v578_v48 = vpack.c.bf16 %v524_v44, %v524_v44  ;;  %v648_v30 = vunpack.c.l.b16 %v577_v13  ;;  %1002 = vrot.lane.b32.xlu2 %v3109_v5, %s2367_s21  ;;  %v968_v40 = vrot.slane %v2966_v37, 1 }
  0xe3   : > { %994 = vrot.lane.b32.xlu1 %v3100_v12, %s2367_s21  ;;  %v3143_v44 = vsel %vm939_vm15, %v979_v41, %v980_v9  ;;  %v946_v13 = vrot.slane %v2493_v52, 1  ;;  %v956_v0 = vrot.slane %v2606_v7, 1  ;;  %v3176_v7 = vpop.permute.xlu2 %915  ;;  %v964_v22 = vrot.slane %v2732_v8, 1 }
  0xe4   : > { %v579_v34 = vpack.c.bf16 %v525_v42, %v525_v42  ;;  %v649_v54 = vunpack.c.l.b16 %v578_v48  ;;  %v947_v42 = vrot.slane %v2512_v4, 1  ;;  %v3148_v57 = vsel %vm939_vm15, %v967_v36, %v968_v40 }
  0xe5   : > { %v976_v48 = vrot.slane %v3073_v20, 1  ;;  %v955_v4 = vrot.slane %v2601_v61, 1  ;;  %v965_v18 = vrot.slane %v2747_v25, 1  ;;  %v973_v25 = vrot.slane %v2862_v21, 1 }
  0xe6   : > { %v3119_v39 = vpack.c.b16 %v649_v54, %v648_v30  ;;  %v697_v32 = vunpack.c.l.b16 %v579_v34  ;;  %v3155_v37 = vsel %vm939_vm15, %v946_v13, %v947_v42  ;;  %v977_v30 = vrot.slane %v3088_v11, 1 }
  0xe7   : > { %v3171_v11 = vsel %vm939_vm15, %v955_v4, %v956_v0  ;;  %vm1258_vm7 = vcmask 31744   ;;  %vm1291_vm8 = vcmask 64512   ;;  %vm1324_vm10 = vcmask 97280  }
  0xe8   : > { %v713_v31 = vpack.c.b16 %v697_v32, %v697_v32  ;;  %v896_v45 = vshrl.u32 %v3119_v39, 16  ;;  %v898_v62 = vshll.u32 %v3119_v39, 16  ;;  %v3164_v50 = vsel %vm939_vm15, %v976_v48, %v977_v30  ;;  %3871 = vst [vmem:[#allocation11_spill] sm:$0xff] %v3171_v11 }
  0xe9   : > { %v985_v34 = vrot.slane %v3119_v39, 1  ;;  %vm1357_vm11 = vcmask 130048   ;;  %vm1390_vm12 = vcmask 162816   ;;  %vm1579_vm13 = vcmask 1041408  }
  0xea   : > { %v900_v43 = vrot.slane %v898_v62, 1  ;;  %v903_v56 = vshll.u32 %v713_v31, 16  ;;  %1008 = vrot.lane.b32.xlu2 %v3122_v19, %s2367_s21  ;;  %v986_v54 = vrot.slane %v713_v31, 1  ;;  %v3188_v31 = vsel %vm939_vm15, %v964_v22, %v965_v18  ;;  %v256_v62 = vld [vmem:[%s2418_s19 + $0x180] sm:$0xff] }
  0xeb   : > { %1000 = vrot.lane.b32.xlu1 %v3127_v47, %s2367_s21  ;;  %3872 = vst [vmem:[#allocation12_spill] sm:$0xff] %v3188_v31  ;;  %v310_v41 = vmul.f32 32.0, %v256_v62  ;;  %v983_v22 = vrot.slane %v3009_v60, 1  ;;  %vm1423_vm2 = vcmask 195584   ;;  %vm1456_vm3 = vcmask 228352  }
  0xec   : > { %v901_v6 = vor.u32 %v900_v43, %v896_v45  ;;  %v905_v17 = vrot.slane %v903_v56, 1  ;;  %v3181_v32 = vsel %vm939_vm15, %v985_v34, %v986_v54  ;;  %v3192_v45 = vpop.permute.xlu2 %917  ;;  %v257_v43 = vld [vmem:[%s2418_s19 + $0x188] sm:$0xff]  ;;  %v974_v56 = vrot.slane %v2878_v23, 1 }
  0xed   : > { %v311_v9 = vmul.f32 32.0, %v257_v43  ;;  %v2266_v48 = vand.u32 2147483648, %v310_v41  ;;  %v2261_v0 = vand.u32 2147483647, %v310_v41  ;;  %v982_v54 = vrot.slane %v3002_v24, 1 }
  0xee   : > { %v3138_v15 = vsel %vm714_vm6, %v901_v6, %v905_v17  ;;  %v2263_v6 = vcvt.f32.s32 %v310_v41  ;;  %v3203_v36 = vsel %vm939_vm15, %v973_v25, %v974_v56 }
  0xef   : > { %3870 = vst [vmem:[#allocation10_spill] sm:$0xff] %v3138_v15  ;;  %937 = vrot.lane.b32.xlu0 %v3138_v15, %s2366_s20  ;;  %v2271_v17 = vcvt.f32.s32 %v311_v9  ;;  %v2274_v4 = vand.u32 2147483648, %v311_v9  ;;  %v2269_v34 = vand.u32 2147483647, %v311_v9  ;;  %vm2262_vm4 = vcmp.lt.f32.partialorder %v2261_v0, 8388608.0  ;;  %v908_v0 = vpop.permute.xlu0 %907 }
  0xf0   : > { %v2264_v40 = vcvt.s32.f32 %v2263_v6 }
  0xf1   : > { %v2272_v13 = vcvt.s32.f32 %v2271_v17  ;;  %vm2270_vm5 = vcmp.lt.f32.partialorder %v2269_v34, 8388608.0  ;;  %v3216_v17 = vsel %vm939_vm15, %v982_v54, %v983_v22  ;;  %v3226_v34 = vpop.permute.xlu1 %911 }
  0xf2   : > { %1014 = vrot.lane.b32.xlu2 %v3143_v44, %s2367_s21  ;;  %v2265_v42 = vand.u32 2147483647, %v2264_v40 }
  0xf3   : > { %1006 = vrot.lane.b32.xlu1 %v3148_v57, %s2367_s21  ;;  %v2273_v30 = vand.u32 2147483647, %v2272_v13 }
  0xf4   : > { %v3207_v23 = vpop.permute.xlu2 %923  ;;  %v2267_v18 = vor.u32 %v2266_v48, %v2265_v42 }
  0xf5   : > { %v2275_v62 = vor.u32 %v2274_v4, %v2273_v30 }
  0xf6   : > { %v2268_v43 = vsel %vm2262_vm4, %v2267_v18, %v310_v41  ;;  %vm1489_vm4 = vcmask 261120  }
  0xf7   : > { %992 = vrot.lane.b32.xlu0 %v3155_v37, %s2367_s21  ;;  %v2276_v25 = vsel %vm2270_vm5, %v2275_v62, %v311_v9  ;;  %v418_v56 = vmax.f32 %v2268_v43, -128.0  ;;  %v910_v18 = vpop.permute.xlu0 %909  ;;  %vm1546_vm5 = vcmask 293888  }
  0xf8   : > { %v419_v6 = vmax.f32 %v2276_v25, -128.0  ;;  %v1262_v43 = vsel %vm1258_vm7, %v2689_v1, %v910_v18 }
  0xf9   : > { %v472_v40 = vmin.f32 %v418_v56, 127.0  ;;  %v914_v62 = vpop.permute.xlu1 %913 }
  0xfa   : > { %1025 = vrot.lane.b32.xlu2 %v2689_v1, %s2368_s22  ;;  %v473_v13 = vmin.f32 %v419_v6, 127.0  ;;  %v258_v1 = vld [vmem:[%s2418_s19 + $0x190] sm:$0x3] }
  0xfb   : > { %1012 = vrot.lane.b32.xlu1 %v3164_v50, %s2367_s21  ;;  %v526_v42 = vmul.f32 0.03125, %v472_v40  ;;  %v1268_v40 = vsel %vm1258_vm7, %v2479_v33, %v3176_v7 }
  0xfc   : > { %v3220_v60 = vpop.permute.xlu2 %929  ;;  %v527_v48 = vmul.f32 0.03125, %v473_v13 }
  0xfd   : > { %v580_v30 = vpack.c.bf16 %v526_v42, %v526_v42 }
  0xfe   : > { %v581_v41 = vpack.c.bf16 %v527_v48, %v527_v48  ;;  %v312_v48 = vmul.f32 32.0, %v258_v1 }
  0xff   : > { %998 = vrot.lane.b32.xlu0 %v3171_v11, %s2367_s21  ;;  %v1022_v9 = vunpack.c.l.b16 %v580_v30 }
 0x100   : > { %v1023_v4 = vunpack.c.l.b16 %v581_v41  ;;  %v2279_v30 = vcvt.f32.s32 %v312_v48  ;;  %v2277_v1 = vand.u32 2147483647, %v312_v48 }
 0x101   : > { %v922_v6 = vpop.permute.xlu1 %921 }
 0x102   : > { %1031 = vrot.lane.b32.xlu2 %v2479_v33, %s2368_s22  ;;  %v3228_v54 = vpack.c.b16 %v1023_v4, %v1022_v9  ;;  %v1274_v9 = vsel %vm1258_vm7, %v2781_v59, %v922_v6  ;;  %v2280_v18 = vcvt.s32.f32 %v2279_v30  ;;  %vm2278_vm9 = vcmp.lt.f32.partialorder %v2277_v1, 8388608.0 }
 0x103   : > { %1018 = vrot.lane.b32.xlu1 %v3181_v32, %s2367_s21 }
 0x104   : > { %3873 = vst [vmem:[#allocation13_spill] sm:$0xff] %v3228_v54 }
 0x107   : > { %1004 = vrot.lane.b32.xlu0 %v3188_v31, %s2367_s21 }
 0x10a   : > { %1037 = vrot.lane.b32.xlu2 %v2781_v59, %s2368_s22 }
 0x10b   : > { %1029 = vrot.lane.b32.xlu1 %v2646_v53, %s2368_s22 }
 0x10f   : > { %1010 = vrot.lane.b32.xlu0 %v3203_v36, %s2367_s21 }
 0x112   : > { %1043 = vrot.lane.b32.xlu2 %v2914_v46, %s2368_s22 }
 0x113   : > { %1035 = vrot.lane.b32.xlu1 %v2818_v14, %s2368_s22 }
 0x117   : > { %1016 = vrot.lane.b32.xlu0 %v3216_v17, %s2367_s21 }
 0x11a   : > { %1049 = vrot.lane.b32.xlu2 %v3036_v2, %s2368_s22 }
 0x11b   : > { %1041 = vrot.lane.b32.xlu1 %v2959_v51, %s2368_s22 }
 0x11f   : > { %1027 = vrot.lane.b32.xlu0 %v2493_v52, %s2368_s22  ;;  %v928_v41 = vpop.permute.xlu1 %927 }
 0x120   : > { %v1280_v6 = vsel %vm1258_vm7, %v2914_v46, %v928_v41 }
 0x121   : > { %v3232_v22 = vpop.permute.xlu2 %935 }
 0x122   : > { %1055 = vrot.lane.b32.xlu2 %v3228_v54, %s2368_s22 }
 0x123   : > { %1047 = vrot.lane.b32.xlu1 %v3073_v20, %s2368_s22 }
 0x127   : > { %1033 = vrot.lane.b32.xlu0 %v2601_v61, %s2368_s22 }
 0x129   : > { %v991_v25 = vpop.permute.xlu2 %990 }
 0x12a   : > { %1076 = vrot.lane.b32.xlu2 %v2671_v35, %s2369_s23  ;;  %v3245_v56 = vsel %vm1291_vm8, %v1262_v43, %v991_v25  ;;  %v2281_v43 = vand.u32 2147483647, %v2280_v18  ;;  %v2282_v25 = vand.u32 2147483648, %v312_v48 }
 0x12b   : > { %1053 = vrot.lane.b32.xlu1 %v3119_v39, %s2368_s22 }
 0x12f   : > { %1039 = vrot.lane.b32.xlu0 %v2732_v8, %s2368_s22 }
 0x132   : > { %1082 = vrot.lane.b32.xlu2 %v2846_v26, %s2369_s23 }
 0x133   : > { %1074 = vrot.lane.b32.xlu1 %v2533_v29, %s2369_s23 }
 0x134   : > { %v997_v13 = vpop.permute.xlu2 %996 }
 0x135   : > { %v3260_v42 = vsel %vm1291_vm8, %v1268_v40, %v997_v13  ;;  %v920_v40 = vpop.permute.xlu0 %919 }
 0x137   : > { %1045 = vrot.lane.b32.xlu0 %v2862_v21, %s2368_s22 }
 0x13a   : > { %1088 = vrot.lane.b32.xlu2 %v2982_v27, %s2369_s23 }
 0x13b   : > { %1080 = vrot.lane.b32.xlu1 %v2626_v28, %s2369_s23 }
 0x13c   : > { %v1003_v7 = vpop.permute.xlu2 %1002 }
 0x13d   : > { %v3271_v4 = vsel %vm1291_vm8, %v1274_v9, %v1003_v7  ;;  %v2283_v7 = vor.u32 %v2282_v25, %v2281_v43  ;;  %v926_v43 = vpop.permute.xlu0 %925 }
 0x13f   : > { %1051 = vrot.lane.b32.xlu0 %v3002_v24, %s2368_s22  ;;  %v2284_v18 = vsel %vm2278_vm9, %v2283_v7, %v312_v48 }
 0x142   : > { %1094 = vrot.lane.b32.xlu2 %v3104_v16, %s2369_s23 }
 0x143   : > { %1086 = vrot.lane.b32.xlu1 %v2764_v49, %s2369_s23  ;;  %v420_v49 = vmax.f32 %v2284_v18, -128.0 }
 0x144   : > { %v1009_v13 = vpop.permute.xlu2 %1008 }
 0x145   : > { %v934_v9 = vpop.permute.xlu1 %933  ;;  %v3282_v30 = vsel %vm1291_vm8, %v1280_v6, %v1009_v13  ;;  %v1260_v6 = vsel %vm1258_vm7, %v2557_v58, %v908_v0  ;;  %v474_v48 = vmin.f32 %v420_v49, 127.0  ;;  %v3874_v49 = vld [vmem:[#allocation5_spill] sm:$0xff] }
 0x146   : > { %v1286_v41 = vsel %vm1258_vm7, %v3036_v2, %v934_v9 }
 0x147   : > { %1072 = vrot.lane.b32.xlu0 %v2715_v63, %s2369_s23  ;;  %v528_v58 = vmul.f32 0.03125, %v474_v48 }
 0x14a   : > { %1100 = vrot.lane.b32.xlu2 %v3138_v15, %s2369_s23 }
 0x14b   : > { %1092 = vrot.lane.b32.xlu1 %v2893_v55, %s2369_s23 }
 0x14c   : > { %v1015_v27 = vpop.permute.xlu2 %1014 }
 0x14d   : > { %v989_v25 = vpop.permute.xlu1 %988  ;;  %v3295_v1 = vsel %vm1291_vm8, %v1286_v41, %v1015_v27  ;;  %v1266_v27 = vsel %vm1258_vm7, %v2646_v53, %v914_v62  ;;  %v582_v41 = vpack.c.bf16 %v528_v58, %v528_v58  ;;  %v1272_v62 = vsel %vm1258_vm7, %v2818_v14, %v920_v40 }
 0x14e   : > { %v1293_v63 = vsel %vm1291_vm8, %v1260_v6, %v989_v25  ;;  %v3875_v6 = vld [vmem:[#allocation8_spill] sm:$0xff]  ;;  %v1061_v40 = vshrl.u32 %v3228_v54, 16 }
 0x14f   : > { %1078 = vrot.lane.b32.xlu0 %v2510_v3, %s2369_s23  ;;  %v1058_v25 = vunpack.c.l.b16 %v582_v41 }
 0x151   : > { %v3324_v58 = vpack.c.b16 %v1058_v25, %v1058_v25 }
 0x152   : > { %1109 = vrot.lane.b32.xlu2 %v3155_v37, %s2370_s24 }
 0x153   : > { %1098 = vrot.lane.b32.xlu1 %v3022_v38, %s2369_s23  ;;  %v932_v18 = vpop.permute.xlu0 %931  ;;  %3877 = vst [vmem:[#allocation5_spill] sm:$0xff] %v3324_v58  ;;  %v1068_v41 = vshll.u32 %v3324_v58, 16 }
 0x154   : > { %v1026_v0 = vpop.permute.xlu2 %1025 }
 0x155   : > { %v995_v13 = vpop.permute.xlu1 %994  ;;  %v3307_v9 = vsel %vm1324_vm10, %v1293_v63, %v1026_v0  ;;  %v1070_v3 = vrot.slane %v1068_v41, 1 }
 0x156   : > { %v1299_v7 = vsel %vm1291_vm8, %v1266_v27, %v995_v13  ;;  %v3876_v13 = vld [vmem:[#allocation6_spill] sm:$0xff] }
 0x157   : > { %1084 = vrot.lane.b32.xlu0 %v3874_v49, %s2369_s23 }
 0x15a   : > { %1115 = vrot.lane.b32.xlu2 %v3171_v11, %s2370_s24  ;;  %v1063_v11 = vshll.u32 %v3228_v54, 16 }
 0x15b   : > { %1107 = vrot.lane.b32.xlu1 %v3875_v6, %s2370_s24 }
 0x15c   : > { %v1032_v48 = vpop.permute.xlu2 %1031 }
 0x15d   : > { %v1001_v63 = vpop.permute.xlu1 %1000  ;;  %v3319_v0 = vsel %vm1324_vm10, %v1299_v7, %v1032_v48  ;;  %v1065_v7 = vrot.slane %v1063_v11, 1  ;;  %v1278_v48 = vsel %vm1258_vm7, %v2959_v51, %v926_v43  ;;  %v1264_v11 = vsel %vm1258_vm7, %v2493_v52, %v3226_v34 }
 0x15e   : > { %v1305_v27 = vsel %vm1291_vm8, %v1272_v62, %v1001_v63 }
 0x15f   : > { %1090 = vrot.lane.b32.xlu0 %v3876_v13, %s2369_s23  ;;  %v1066_v28 = vor.u32 %v1065_v7, %v1061_v40  ;;  %v1284_v40 = vsel %vm1258_vm7, %v3073_v20, %v932_v18 }
 0x161   : > { %v938_v15 = vpop.permute.xlu0 %937  ;;  %v3350_v43 = vsel %vm714_vm6, %v1066_v28, %v1070_v3 }
 0x162   : > { %1121 = vrot.lane.b32.xlu2 %v3188_v31, %s2370_s24  ;;  %v3878_v31 = vld [vmem:[#allocation9_spill] sm:$0xff]  ;;  %v1290_v18 = vsel %vm1258_vm7, %v3119_v39, %v938_v15 }
 0x163   : > { %1113 = vrot.lane.b32.xlu1 %v3086_v10, %s2370_s24 }
 0x164   : > { %v1038_v6 = vpop.permute.xlu2 %1037 }
 0x165   : > { %v1007_v25 = vpop.permute.xlu1 %1006  ;;  %v3336_v62 = vsel %vm1324_vm10, %v1305_v27, %v1038_v6 }
 0x166   : > { %v1311_v63 = vsel %vm1291_vm8, %v1278_v48, %v1007_v25 }
 0x167   : > { %1096 = vrot.lane.b32.xlu0 %v3878_v31, %s2369_s23 }
 0x169   : > { %v993_v58 = vpop.permute.xlu0 %992 }
 0x16a   : > { %v1297_v54 = vsel %vm1291_vm8, %v1264_v11, %v993_v58  ;;  %1207 = vrot.lane.b32.xlu2 %v3876_v13, %s2371_s25  ;;  %v1270_v13 = vsel %vm1258_vm7, %v2601_v61, %v3192_v45 }
 0x16b   : > { %1119 = vrot.lane.b32.xlu1 %v3109_v5, %s2370_s24 }
 0x16c   : > { %v1044_v27 = vpop.permute.xlu2 %1043 }
 0x16d   : > { %v1013_v7 = vpop.permute.xlu1 %1012  ;;  %v3355_v34 = vsel %vm1324_vm10, %v1311_v63, %v1044_v27 }
 0x16e   : > { %v1317_v58 = vsel %vm1291_vm8, %v1284_v40, %v1013_v7 }
 0x16f   : > { %1102 = vrot.lane.b32.xlu0 %v3350_v43, %s2369_s23 }
 0x171   : > { %v999_v41 = vpop.permute.xlu0 %998 }
 0x172   : > { %v1303_v3 = vsel %vm1291_vm8, %v1270_v13, %v999_v41  ;;  %1191 = vrot.lane.b32.xlu2 %v2533_v29, %s2371_s25  ;;  %v1276_v29 = vsel %vm1258_vm7, %v2732_v8, %v3207_v23  ;;  %v1282_v23 = vsel %vm1258_vm7, %v2862_v21, %v3220_v60 }
 0x173   : > { %1160 = vrot.lane.b32.xlu1 %v2914_v46, %s2372_s26 }
 0x174   : > { %v1050_v28 = vpop.permute.xlu2 %1049 }
 0x175   : > { %v1019_v6 = vpop.permute.xlu1 %1018  ;;  %v3371_v48 = vsel %vm1324_vm10, %v1317_v58, %v1050_v28 }
 0x176   : > { %v1323_v45 = vsel %vm1291_vm8, %v1290_v18, %v1019_v6 }
 0x177   : > { %1111 = vrot.lane.b32.xlu0 %v3100_v12, %s2370_s24 }
 0x179   : > { %v1005_v25 = vpop.permute.xlu0 %1004 }
 0x17a   : > { %v1309_v46 = vsel %vm1291_vm8, %v1276_v29, %v1005_v25  ;;  %1162 = vrot.lane.b32.xlu2 %v2862_v21, %s2372_s26  ;;  %v1288_v21 = vsel %vm1258_vm7, %v3002_v24, %v3232_v22 }
 0x17b   : > { %1144 = vrot.lane.b32.xlu1 %v2493_v52, %s2372_s26 }
 0x17c   : > { %v1056_v15 = vpop.permute.xlu2 %1055 }
 0x17d   : > { %v1030_v63 = vpop.permute.xlu1 %1029  ;;  %v3385_v11 = vsel %vm1324_vm10, %v1323_v45, %v1056_v15 }
 0x17e   : > { %v1330_v27 = vsel %vm1324_vm10, %v1297_v54, %v1030_v63 }
 0x17f   : > { %1117 = vrot.lane.b32.xlu0 %v3127_v47, %s2370_s24 }
 0x181   : > { %v1011_v40 = vpop.permute.xlu0 %1010 }
 0x182   : > { %v1315_v7 = vsel %vm1291_vm8, %v1282_v23, %v1011_v40  ;;  %1146 = vrot.lane.b32.xlu2 %v2646_v53, %s2372_s26 }
 0x183   : > { %1125 = vrot.lane.b32.xlu1 %v3122_v19, %s2370_s24 }
 0x184   : > { %v1077_v52 = vpop.permute.xlu2 %1076 }
 0x185   : > { %v1036_v58 = vpop.permute.xlu1 %1035  ;;  %v3399_v54 = vsel %vm1357_vm11, %v1330_v27, %v1077_v52 }
 0x186   : > { %v1336_v13 = vsel %vm1324_vm10, %v1303_v3, %v1036_v58 }
 0x187   : > { %1123 = vrot.lane.b32.xlu0 %v3148_v57, %s2370_s24 }
 0x189   : > { %v1017_v60 = vpop.permute.xlu0 %1016 }
 0x18a   : > { %v1321_v53 = vsel %vm1291_vm8, %v1288_v21, %v1017_v60  ;;  %1168 = vrot.lane.b32.xlu2 %v3002_v24, %s2372_s26 }
 0x18b   : > { %1244 = vrot.lane.b32.xlu1 %v3203_v36, %s2373_s27 }
 0x18c   : > { %v1083_v41 = vpop.permute.xlu2 %1082 }
 0x18d   : > { %v1042_v28 = vpop.permute.xlu1 %1041  ;;  %v3413_v3 = vsel %vm1357_vm11, %v1336_v13, %v1083_v41  ;;  %v260_v41 = vld [vmem:[%s2418_s19 + $0x1a0] sm:$0xff] }
 0x18e   : > { %v3416_v18 = vsel %vm1324_vm10, %v1309_v46, %v1042_v28 }
 0x18f   : > { %1242 = vrot.lane.b32.xlu0 %v3122_v19, %s2373_s27 }
 0x191   : > { %v1028_v22 = vpop.permute.xlu0 %1027 }
 0x192   : > { %v1328_v6 = vsel %vm1324_vm10, %v3245_v56, %v1028_v22  ;;  %1250 = vrot.lane.b32.xlu2 %v3216_v17, %s2373_s27  ;;  %v314_v22 = vmul.f32 32.0, %v260_v41 }
 0x193   : > { %1193 = vrot.lane.b32.xlu1 %v2671_v35, %s2371_s25 }
 0x194   : > { %v3426_v24 = vpop.permute.xlu2 %1088 }
 0x195   : > { %v1048_v45 = vpop.permute.xlu1 %1047 }
 0x196   : > { %v1348_v29 = vsel %vm1324_vm10, %v1315_v7, %v1048_v45  ;;  %v3880_v45 = vld [vmem:[#allocation3_spill] sm:$0xff] }
 0x197   : > { %1226 = vrot.lane.b32.xlu0 %v3155_v37, %s2373_s27 }
 0x199   : > { %v1034_v25 = vpop.permute.xlu0 %1033 }
 0x19a   : > { %v1334_v19 = vsel %vm1324_vm10, %v3260_v42, %v1034_v25  ;;  %1199 = vrot.lane.b32.xlu2 %v2846_v26, %s2371_s25 }
 0x19b   : > { %1215 = vrot.lane.b32.xlu1 %v3022_v38, %s2371_s25 }
 0x19c   : > { %v1095_v56 = vpop.permute.xlu2 %1094 }
 0x19d   : > { %v1054_v35 = vpop.permute.xlu1 %1053  ;;  %v3438_v46 = vsel %vm1357_vm11, %v1348_v29, %v1095_v56  ;;  %v261_v29 = vld [vmem:[%s2418_s19 + $0x1a8] sm:$0x3] }
 0x19e   : > { %v1354_v15 = vsel %vm1324_vm10, %v1321_v53, %v1054_v35  ;;  %v259_v53 = vld [vmem:[%s2418_s19 + $0x198] sm:$0xff] }
 0x19f   : > { %1209 = vrot.lane.b32.xlu0 %v2893_v55, %s2371_s25  ;;  %v313_v28 = vmul.f32 32.0, %v259_v53 }
 0x1a1   : > { %v1040_v37 = vpop.permute.xlu0 %1039 }
 0x1a2   : > { %v1340_v42 = vsel %vm1324_vm10, %v3271_v4, %v1040_v37  ;;  %1211 = vrot.lane.b32.xlu2 %v3104_v16, %s2371_s25 }
 0x1a3   : > { %1127 = vrot.lane.b32.xlu1 %v3203_v36, %s2370_s24 }
 0x1a4   : > { %v1101_v26 = vpop.permute.xlu2 %1100 }
 0x1a5   : > { %v1075_v38 = vpop.permute.xlu1 %1074  ;;  %v3450_v63 = vsel %vm1357_vm11, %v1354_v15, %v1101_v26 }
 0x1a6   : > { %v1361_v27 = vsel %vm1357_vm11, %v1328_v6, %v1075_v38 }
 0x1a7   : > { %1131 = vrot.lane.b32.xlu0 %v3143_v44, %s2370_s24 }
 0x1a9   : > { %v1046_v55 = vpop.permute.xlu0 %1045 }
 0x1aa   : > { %v1346_v4 = vsel %vm1324_vm10, %v3282_v30, %v1046_v55  ;;  %1133 = vrot.lane.b32.xlu2 %v3216_v17, %s2370_s24  ;;  %v3881_v55 = vld [vmem:[#allocation10_spill] sm:$0xff] }
 0x1ab   : > { %1234 = vrot.lane.b32.xlu1 %v3127_v47, %s2373_s27 }
 0x1ac   : > { %v1110_v16 = vpop.permute.xlu2 %1109 }
 0x1ad   : > { %v1081_v36 = vpop.permute.xlu1 %1080  ;;  %v3462_v23 = vsel %vm1390_vm12, %v1361_v27, %v1110_v16  ;;  %v2290_v27 = vand.u32 2147483648, %v313_v28  ;;  %v2285_v16 = vand.u32 2147483647, %v313_v28 }
 0x1ae   : > { %v1367_v40 = vsel %vm1357_vm11, %v1334_v19, %v1081_v36  ;;  %v315_v19 = vmul.f32 32.0, %v261_v29  ;;  %v2293_v36 = vand.u32 2147483647, %v314_v22 }
 0x1af   : > { %1228 = vrot.lane.b32.xlu0 %v3100_v12, %s2373_s27  ;;  %vm2286_vm14 = vcmp.lt.f32.partialorder %v2285_v16, 8388608.0 }
 0x1b0   : > { %vm3535_vm0 = vcmp.lt.f32.partialorder %v2293_v36, 8388608.0 }
 0x1b1   : > { %v1052_v7 = vpop.permute.xlu0 %1051 }
 0x1b2   : > { %v1352_v30 = vsel %vm1324_vm10, %v3295_v1, %v1052_v7  ;;  %1230 = vrot.lane.b32.xlu2 %v3086_v10, %s2373_s27  ;;  %v2298_v7 = vand.u32 2147483648, %v314_v22 }
 0x1b3   : > { %1148 = vrot.lane.b32.xlu1 %v2479_v33, %s2372_s26 }
 0x1b4   : > { %v1116_v47 = vpop.permute.xlu2 %1115 }
 0x1b5   : > { %v1087_v17 = vpop.permute.xlu1 %1086  ;;  %v3474_v52 = vsel %vm1390_vm12, %v1367_v40, %v1116_v47 }
 0x1b6   : > { %v1373_v58 = vsel %vm1357_vm11, %v1340_v42, %v1087_v17  ;;  %v2303_v42 = vcvt.f32.s32 %v315_v19 }
 0x1b7   : > { %1152 = vrot.lane.b32.xlu0 %v2818_v14, %s2372_s26 }
 0x1b9   : > { %v1073_v12 = vpop.permute.xlu0 %1072 }
 0x1ba   : > { %v3481_v1 = vsel %vm1357_vm11, %v3307_v9, %v1073_v12  ;;  %1154 = vrot.lane.b32.xlu2 %v2781_v59, %s2372_s26 }
 0x1bb   : > { %1170 = vrot.lane.b32.xlu1 %v3119_v39, %s2372_s26 }
 0x1bc   : > { %v1122_v33 = vpop.permute.xlu2 %1121 }
 0x1bd   : > { %v1093_v10 = vpop.permute.xlu1 %1092  ;;  %v3488_v13 = vsel %vm1390_vm12, %v1373_v58, %v1122_v33  ;;  %v1866_v58 = vld [vmem:[%s3748_s1 + $0x8] sm:$0xff] }
 0x1be   : > { %v3491_v21 = vsel %vm1357_vm11, %v1346_v4, %v1093_v10  ;;  %v2301_v10 = vand.u32 2147483647, %v315_v19 }
 0x1bf   : > { %1164 = vrot.lane.b32.xlu0 %v3073_v20, %s2372_s26 }
 0x1c0   : > { %vm2302_vm1 = vcmp.lt.f32.partialorder %v2301_v10, 8388608.0 }
 0x1c1   : > { %v1079_v14 = vpop.permute.xlu0 %1078 }
 0x1c2   : > { %v1365_v59 = vsel %vm1357_vm11, %v3319_v0, %v1079_v14  ;;  %1166 = vrot.lane.b32.xlu2 %v3036_v2, %s2372_s26  ;;  %v3879_v0 = vld [vmem:[#allocation2_spill] sm:$0xff]  ;;  %v2306_v14 = vand.u32 2147483648, %v315_v19 }
 0x1c3   : > { %1252 = vrot.lane.b32.xlu1 %v3181_v32, %s2373_s27 }
 0x1c5   : > { %v1099_v39 = vpop.permute.xlu1 %1098 }
 0x1c6   : > { %v3502_v9 = vsel %vm1357_vm11, %v1352_v30, %v1099_v39  ;;  %v2304_v30 = vcvt.s32.f32 %v2303_v42  ;;  %v3546_v39 = vpop.permute.xlu2 %1207 }
 0x1c7   : > { %1246 = vrot.lane.b32.xlu0 %v3164_v50, %s2373_s27 }
 0x1c9   : > { %v1085_v60 = vpop.permute.xlu0 %1084 }
 0x1ca   : > { %v1371_v20 = vsel %vm1357_vm11, %v3336_v62, %v1085_v60  ;;  %1248 = vrot.lane.b32.xlu2 %v3143_v44, %s2373_s27  ;;  %v1526_v44 = vld [vmem:[%s3748_s1 + $0x10] sm:$0x3]  ;;  %v2287_v62 = vcvt.f32.s32 %v313_v28 }
 0x1cb   : > { %1201 = vrot.lane.b32.xlu1 %v3874_v49, %s2371_s25  ;;  %v2295_v49 = vcvt.f32.s32 %v314_v22  ;;  %v1540_v25 = vunpack.c.l.b16 %v1526_v44 }
 0x1cc   : > { %v2288_v56 = vcvt.s32.f32 %v2287_v62 }
 0x1cd   : > { %v3512_v2 = vpop.permute.xlu1 %1107  ;;  %v2296_v35 = vcvt.s32.f32 %v2295_v49  ;;  %v1543_v37 = vpack.c.b16 %v1540_v25, %v1540_v25 }
 0x1ce   : > { %v2289_v38 = vand.u32 2147483647, %v2288_v56 }
 0x1cf   : > { %1195 = vrot.lane.b32.xlu0 %v3879_v0, %s2371_s25  ;;  %v1581_v4 = vsel %vm1579_vm13, %v1543_v37, 0  ;;  %v2297_v40 = vand.u32 2147483647, %v2296_v35  ;;  %v3884_v35 = vld [vmem:[#allocation4_spill] sm:$0xff] }
 0x1d0   : > { %1868 = vmatpush.bf16.msra.mxu2 %v1581_v4  ;;  %1588 = vmatpush.bf16.msra.mxu0 %v1581_v4 }
 0x1d1   : > { %v3518_v6 = vpop.permute.xlu0 %1090  ;;  %1869 = vmatpush.bf16.msra.mxu3 %v1581_v4  ;;  %1867 = vmatpush.bf16.msra.mxu1 %v1581_v4  ;;  %v2299_v33 = vor.u32 %v2298_v7, %v2297_v40  ;;  %v3886_v40 = vld [vmem:[#allocation13_spill] sm:$0xff] }
 0x1d2   : > { %1197 = vrot.lane.b32.xlu2 %v3880_v45, %s2371_s25  ;;  %v1104_v7 = vrot.slane %v3886_v40, 1 }
 0x1d3   : > { %1213 = vrot.lane.b32.xlu1 %v3878_v31, %s2371_s25  ;;  %v2291_v31 = vor.u32 %v2290_v27, %v2289_v38  ;;  %v2300_v60 = vsel %vm3535_vm0, %v2299_v33, %v314_v22  ;;  %v1192_v27 = vpop.permute.xlu2 %1191 }
 0x1d4   : > { %1871 = vmatpush.bf16.msra.mxu2 %v1866_v58  ;;  %1589 = vmatpush.bf16.msra.mxu0 %v1866_v58  ;;  %v422_v53 = vmax.f32 %v2300_v60, -128.0 }
 0x1d5   : > { %v1114_v15 = vpop.permute.xlu1 %1113  ;;  %v2292_v12 = vsel %vm2286_vm14, %v2291_v31, %v313_v28  ;;  %1872 = vmatpush.bf16.msra.mxu3 %v1866_v58  ;;  %1870 = vmatpush.bf16.msra.mxu1 %v1866_v58 }
 0x1d6   : > { %v3529_v26 = vsel %vm1390_vm12, %v1365_v59, %v1114_v15  ;;  %v421_v59 = vmax.f32 %v2292_v12, -128.0  ;;  %v476_v44 = vmin.f32 %v422_v53, 127.0 }
 0x1d7   : > { %1217 = vrot.lane.b32.xlu0 %v3881_v55, %s2371_s25 }
 0x1d8   : > { %v475_v41 = vmin.f32 %v421_v59, 127.0  ;;  %v530_v29 = vmul.f32 0.03125, %v476_v44 }
 0x1d9   : > { %v3533_v47 = vpop.permute.xlu0 %1096 }
 0x1da   : > { %1219 = vrot.lane.b32.xlu2 %v3350_v43, %s2371_s25  ;;  %v2305_v43 = vand.u32 2147483647, %v2304_v30  ;;  %v529_v22 = vmul.f32 0.03125, %v475_v41  ;;  %v584_v15 = vpack.c.bf16 %v530_v29, %v530_v29  ;;  %v3887_v30 = vld [vmem:[#allocation5_spill] sm:$0xff] }
 0x1db   : > { %1135 = vrot.lane.b32.xlu1 %v3181_v32, %s2370_s24  ;;  %v1865_v32 = vld [vmem:[%s3748_s1] sm:$0xff]  ;;  %v1105_v17 = vrot.slane %v3887_v30, 1 }
 0x1dc   : > { %v2307_v45 = vor.u32 %v2306_v14, %v2305_v43  ;;  %1874 = vmatpush.bf16.msra.mxu2 %v1865_v32  ;;  %1590 = vmatpush.bf16.msra.mxu0 %v1865_v32  ;;  %v583_v25 = vpack.c.bf16 %v529_v22, %v529_v22  ;;  %v1142_v38 = vunpack.c.l.b16 %v584_v15 }
 0x1dd   : > { %v1120_v0 = vpop.permute.xlu1 %1119  ;;  %1875 = vmatpush.bf16.msra.mxu3 %v1865_v32  ;;  %1873 = vmatpush.bf16.msra.mxu1 %v1865_v32  ;;  %v1106_v33 = vsel %vm939_vm15, %v1104_v7, %v1105_v17 }
 0x1de   : > { %v3551_v28 = vsel %vm1390_vm12, %v1371_v20, %v1120_v0  ;;  %v2308_v62 = vsel %vm2302_vm1, %v2307_v45, %v315_v19  ;;  %v1141_v37 = vunpack.c.l.b16 %v583_v25 }
 0x1df   : > { %1129 = vrot.lane.b32.xlu0 %v3164_v50, %s2370_s24  ;;  %v423_v56 = vmax.f32 %v2308_v62, -128.0  ;;  %v3885_v50 = vld [vmem:[#allocation11_spill] sm:$0xff] }
 0x1e0   : > { %v1143_v4 = vpack.c.b16 %v1142_v38, %v1141_v37 }
 0x1e1   : > { %v1103_v49 = vpop.permute.xlu0 %1102  ;;  %v477_v42 = vmin.f32 %v423_v56, 127.0 }
 0x1e2   : > { %v3560_v20 = vsel %vm1357_vm11, %v3385_v11, %v1103_v49  ;;  %1203 = vrot.lane.b32.xlu2 %v3884_v35, %s2371_s25  ;;  %v1223_v10 = vrot.slane %v1143_v4, 1  ;;  %v1182_v41 = vshll.u32 %v1143_v4, 16  ;;  %v1180_v44 = vshrl.u32 %v1143_v4, 16 }
 0x1e3   : > { %1232 = vrot.lane.b32.xlu1 %v3885_v50, %s2373_s27  ;;  %v531_v55 = vmul.f32 0.03125, %v477_v42  ;;  %v1392_v49 = vsel %vm1390_vm12, %v3481_v1, %v3512_v2  ;;  %v1377_v1 = vsel %vm1357_vm11, %v3355_v34, %v3518_v6  ;;  %v1383_v6 = vsel %vm1357_vm11, %v3371_v48, %v3533_v47 }
 0x1e4   : > { %v1184_v22 = vrot.slane %v1182_v41, 1 }
 0x1e5   : > { %v1161_v19 = vpop.permute.xlu1 %1160  ;;  %v585_v36 = vpack.c.bf16 %v531_v55, %v531_v55 }
 0x1e6   : > { %v1185_v56 = vor.u32 %v1184_v22, %v1180_v44 }
 0x1e7   : > { %1236 = vrot.lane.b32.xlu0 %v3109_v5, %s2373_s27  ;;  %v1177_v58 = vunpack.c.l.b16 %v585_v36  ;;  %v1163_v5 = vpop.permute.xlu2 %1162  ;;  %v3889_v36 = vld [vmem:[#allocation7_spill] sm:$0xff] }
 0x1e9   : > { %v1112_v16 = vpop.permute.xlu0 %1111 }
 0x1ea   : > { %v3570_v11 = vsel %vm1390_vm12, %v3399_v54, %v1112_v16  ;;  %1174 = vrot.lane.b32.xlu2 %v1143_v4, %s2372_s26 }
 0x1eb   : > { %1156 = vrot.lane.b32.xlu1 %v2732_v8, %s2372_s26  ;;  %v1178_v8 = vpack.c.b16 %v1177_v58, %v1177_v58 }
 0x1ed   : > { %v1145_v31 = vpop.permute.xlu1 %1144  ;;  %v1224_v14 = vrot.slane %v1178_v8, 1  ;;  %v1187_v62 = vshll.u32 %v1178_v8, 16 }
 0x1ee   : > { %v1425_v25 = vsel %vm1423_vm2, %v1392_v49, %v1145_v31 }
 0x1ef   : > { %1150 = vrot.lane.b32.xlu0 %v2601_v61, %s2372_s26  ;;  %v1225_v61 = vsel %vm939_vm15, %v1223_v10, %v1224_v14  ;;  %v1147_v43 = vpop.permute.xlu2 %1146  ;;  %v1189_v35 = vrot.slane %v1187_v62, 1  ;;  %v1458_v15 = vsel %vm1456_vm3, %v1425_v25, %v1192_v27 }
 0x1f1   : > { %v1118_v12 = vpop.permute.xlu0 %1117  ;;  %v1190_v37 = vsel %vm714_vm6, %v1185_v56, %v1189_v35 }
 0x1f2   : > { %v3581_v54 = vsel %vm1390_vm12, %v3413_v3, %v1118_v12  ;;  %1158 = vrot.lane.b32.xlu2 %v2959_v51, %s2372_s26  ;;  %v1375_v3 = vsel %vm1357_vm11, %v3416_v18, %v3426_v24 }
 0x1f3   : > { %1137 = vrot.lane.b32.xlu1 %v1106_v33, %s2370_s24 }
 0x1f5   : > { %v1126_v59 = vpop.permute.xlu1 %1125 }
 0x1f7   : > { %1172 = vrot.lane.b32.xlu0 %v3886_v40, %s2372_s26  ;;  %v1169_v24 = vpop.permute.xlu2 %1168 }
 0x1f9   : > { %v1124_v60 = vpop.permute.xlu0 %1123 }
 0x1fa   : > { %v1408_v51 = vsel %vm1390_vm12, %v1375_v3, %v1124_v60 }
 0x1fb   : > { %1256 = vrot.lane.b32.xlu1 %v1225_v61, %s2373_s27  ;;  %v1441_v53 = vsel %vm1423_vm2, %v1408_v51, %v1161_v19  ;;  %v1410_v19 = vsel %vm1390_vm12, %v1377_v1, %v1126_v59 }
 0x1fc   : > { %v1474_v45 = vsel %vm1456_vm3, %v1441_v53, %v3546_v39  ;;  %v3888_v39 = vld [vmem:[#allocation12_spill] sm:$0xff]  ;;  %v1443_v38 = vsel %vm1423_vm2, %v1410_v19, %v1163_v5  ;;  %v1427_v5 = vsel %vm1423_vm2, %v3462_v23, %v1147_v43 }
 0x1fd   : > { %v1245_v0 = vpop.permute.xlu1 %1244 }
 0x1ff   : > { %1254 = vrot.lane.b32.xlu0 %v1106_v33, %s2373_s27  ;;  %v1251_v42 = vpop.permute.xlu2 %1250 }
 0x201   : > { %v1243_v32 = vpop.permute.xlu0 %1242 }
 0x202   : > { %v1507_v18 = vsel %vm1489_vm4, %v1474_v45, %v1243_v32 }
 0x203   : > { %1854 = vmatmul.msk.bf16.vlgmr.msra.gmra.mxu2 %vm1546_vm5, %v1507_v18  ;;  %1240 = vrot.lane.b32.xlu1 %v3148_v57, %s2373_s27 }
 0x205   : > { %v1194_v29 = vpop.permute.xlu1 %1193 }
 0x206   : > { %v1460_v12 = vsel %vm1456_vm3, %v1427_v5, %v1194_v29 }
 0x207   : > { %1238 = vrot.lane.b32.xlu0 %v3888_v39, %s2373_s27  ;;  %v1200_v34 = vpop.permute.xlu2 %1199 }
 0x209   : > { %v1227_v50 = vpop.permute.xlu0 %1226 }
 0x20a   : > { %v1491_v57 = vsel %vm1489_vm4, %v1458_v15, %v1227_v50 }
 0x20b   : > { %1846 = vmatmul.msk.bf16.vlgmr.msra.gmra.mxu0 %vm1546_vm5, %v1491_v57 }
 0x20d   : > { %v1216_v2 = vpop.permute.xlu1 %1215 }
 0x20f   : > { %1221 = vrot.lane.b32.xlu0 %v1190_v37, %s2371_s25  ;;  %v1212_v8 = vpop.permute.xlu2 %1211 }
 0x211   : > { %v1210_v55 = vpop.permute.xlu0 %1209 }
 0x212   : > { %v1476_v27 = vsel %vm1456_vm3, %v1443_v38, %v1210_v55 }
 0x213   : > { %v1509_v4 = vsel %vm1489_vm4, %v1476_v27, %v1245_v0 }
 0x214   : > { %1855 = vmatmul.msk.bf16.gmra.mxu2 %vm1546_vm5, %v1509_v4 }
 0x215   : > { %v1128_v16 = vpop.permute.xlu1 %1127 }
 0x216   : > { %v1412_v43 = vsel %vm1390_vm12, %v3491_v21, %v1128_v16 }
 0x217   : > { %1205 = vrot.lane.b32.xlu0 %v3889_v36, %s2371_s25  ;;  %v1134_v61 = vpop.permute.xlu2 %1133 }
 0x218   : > { %v1418_v62 = vsel %vm1390_vm12, %v3502_v9, %v1134_v61 }
 0x219   : > { %v1132_v31 = vpop.permute.xlu0 %1131 }
 0x21a   : > { %v1416_v40 = vsel %vm1390_vm12, %v1383_v6, %v1132_v31 }
 0x21b   : > { %v1449_v7 = vsel %vm1423_vm2, %v1416_v40, %v1169_v24 }
 0x21c   : > { %v1482_v30 = vsel %vm1456_vm3, %v1449_v7, %v1216_v2 }
 0x21d   : > { %v1515_v17 = vsel %vm1489_vm4, %v1482_v30, %v1251_v42  ;;  %v1235_v58 = vpop.permute.xlu1 %1234 }
 0x21e   : > { %1858 = vmatmul.msk.bf16.vlgmr.msra.gmra.mxu3 %vm1546_vm5, %v1515_v17 }
 0x21f   : > { %v1231_v51 = vpop.permute.xlu2 %1230 }
 0x221   : > { %v1229_v33 = vpop.permute.xlu0 %1228 }
 0x222   : > { %v1493_v48 = vsel %vm1489_vm4, %v1460_v12, %v1229_v33 }
 0x223   : > { %1847 = vmatmul.msk.bf16.gmra.mxu0 %vm1546_vm5, %v1493_v48 }
 0x225   : > { %v1149_v47 = vpop.permute.xlu1 %1148 }
 0x226   : > { %v1429_v18 = vsel %vm1423_vm2, %v3570_v11, %v1149_v47 }
 0x227   : > { %v1155_v45 = vpop.permute.xlu2 %1154 }
 0x228   : > { %v1435_v2 = vsel %vm1423_vm2, %v3581_v54, %v1155_v45 }
 0x229   : > { %v1153_v10 = vpop.permute.xlu0 %1152 }
 0x22a   : > { %v1433_v14 = vsel %vm1423_vm2, %v3474_v52, %v1153_v10 }
 0x22b   : > { %v1466_v59 = vsel %vm1456_vm3, %v1433_v14, %v1200_v34 }
 0x22c   : > { %v1499_v60 = vsel %vm1489_vm4, %v1466_v59, %v1235_v58 }
 0x22d   : > { %1850 = vmatmul.msk.bf16.vlgmr.msra.gmra.mxu1 %vm1546_vm5, %v1499_v60  ;;  %v1171_v23 = vpop.permute.xlu1 %1170 }
 0x22e   : > { %v1451_v49 = vsel %vm1423_vm2, %v1418_v62, %v1171_v23 }
 0x22f   : > { %v1167_v25 = vpop.permute.xlu2 %1166 }
 0x231   : > { %v1165_v3 = vpop.permute.xlu0 %1164 }
 0x232   : > { %v1445_v0 = vsel %vm1423_vm2, %v1412_v43, %v1165_v3 }
 0x233   : > { %v1478_v32 = vsel %vm1456_vm3, %v1445_v0, %v1212_v8 }
 0x235   : > { %v1253_v53 = vpop.permute.xlu1 %1252 }
 0x237   : > { %v1249_v57 = vpop.permute.xlu2 %1248 }
 0x239   : > { %v1247_v41 = vpop.permute.xlu0 %1246 }
 0x23a   : > { %v1511_v52 = vsel %vm1489_vm4, %v1478_v32, %v1247_v41 }
 0x23b   : > { %1856 = vmatmul.msk.bf16.gmra.mxu2 %vm1546_vm5, %v1511_v52 }
 0x23d   : > { %v1202_v22 = vpop.permute.xlu1 %1201 }
 0x23e   : > { %v1468_v42 = vsel %vm1456_vm3, %v1435_v2, %v1202_v22 }
 0x241   : > { %v1196_v24 = vpop.permute.xlu0 %1195 }
 0x242   : > { %v1462_v44 = vsel %vm1456_vm3, %v1429_v18, %v1196_v24 }
 0x243   : > { %v1495_v21 = vsel %vm1489_vm4, %v1462_v44, %v1231_v51 }
 0x244   : > { %1848 = vmatmul.msk.bf16.gmra.mxu0 %vm1546_vm5, %v1495_v21 }
 0x245   : > { %v1214_v11 = vpop.permute.xlu1 %1213 }
 0x249   : > { %v1218_v29 = vpop.permute.xlu0 %1217 }
 0x24a   : > { %v1484_v39 = vsel %vm1456_vm3, %v1451_v49, %v1218_v29 }
 0x24b   : > { %v1517_v56 = vsel %vm1489_vm4, %v1484_v39, %v1253_v53 }
 0x24c   : > { %1859 = vmatmul.msk.bf16.gmra.mxu3 %vm1546_vm5, %v1517_v56 }
 0x24d   : > { %v1136_v1 = vpop.permute.xlu1 %1135 }
 0x24e   : > { %v1420_v31 = vsel %vm1390_vm12, %v3450_v63, %v1136_v1 }
 0x251   : > { %v1130_v35 = vpop.permute.xlu0 %1129 }
 0x252   : > { %v1414_v50 = vsel %vm1390_vm12, %v3438_v46, %v1130_v35  ;;  %v1198_v46 = vpop.permute.xlu2 %1197 }
 0x253   : > { %v1447_v15 = vsel %vm1423_vm2, %v1414_v50, %v1167_v25 }
 0x254   : > { %v1480_v9 = vsel %vm1456_vm3, %v1447_v15, %v1214_v11 }
 0x255   : > { %v1513_v37 = vsel %vm1489_vm4, %v1480_v9, %v1249_v57  ;;  %v1233_v55 = vpop.permute.xlu1 %1232 }
 0x256   : > { %1857 = vmatmul.msk.bf16.gmra.mxu2 %vm1546_vm5, %v1513_v37 }
 0x259   : > { %v1237_v19 = vpop.permute.xlu0 %1236 }
 0x25a   : > { %v1501_v38 = vsel %vm1489_vm4, %v1468_v42, %v1237_v19  ;;  %v1220_v54 = vpop.permute.xlu2 %1219 }
 0x25b   : > { %1851 = vmatmul.msk.bf16.gmra.mxu1 %vm1546_vm5, %v1501_v38 }
 0x25d   : > { %v1157_v6 = vpop.permute.xlu1 %1156 }
 0x25e   : > { %v1437_v5 = vsel %vm1423_vm2, %v3551_v28, %v1157_v6  ;;  %v3694_v28 = vld [vmem:[%s3749_s2] ss:$0 sm:$0xff] }
 0x261   : > { %v1151_v27 = vpop.permute.xlu0 %1150 }
 0x262   : > { %v1431_v4 = vsel %vm1423_vm2, %v3529_v26, %v1151_v27  ;;  %v1204_v17 = vpop.permute.xlu2 %1203 }
 0x263   : > { %v1464_v16 = vsel %vm1456_vm3, %v1431_v4, %v1198_v46  ;;  %v1470_v33 = vsel %vm1456_vm3, %v1437_v5, %v1204_v17 }
 0x264   : > { %v1497_v36 = vsel %vm1489_vm4, %v1464_v16, %v1233_v55 }
 0x265   : > { %1849 = vmatmul.msk.bf16.gmra.mxu0 %vm1546_vm5, %v1497_v36  ;;  %v1138_v58 = vpop.permute.xlu1 %1137 }
 0x266   : > { %v1422_v48 = vsel %vm1390_vm12, %v3560_v20, %v1138_v58 }
 0x269   : > { %v1173_v34 = vpop.permute.xlu0 %1172 }
 0x26a   : > { %v1453_v40 = vsel %vm1423_vm2, %v1420_v31, %v1173_v34  ;;  %v1175_v63 = vpop.permute.xlu2 %1174 }
 0x26b   : > { %v1486_v30 = vsel %vm1456_vm3, %v1453_v40, %v1220_v54  ;;  %v1455_v10 = vsel %vm1423_vm2, %v1422_v48, %v1175_v63 }
 0x26d   : > { %v1257_v47 = vpop.permute.xlu1 %1256 }
 0x271   : > { %v1255_v7 = vpop.permute.xlu0 %1254 }
 0x272   : > { %v1519_v26 = vsel %vm1489_vm4, %v1486_v30, %v1255_v7  ;;  %v1159_v60 = vpop.permute.xlu2 %1158 }
 0x273   : > { %1860 = vmatmul.msk.bf16.gmra.mxu3 %vm1546_vm5, %v1519_v26  ;;  %v1439_v51 = vsel %vm1423_vm2, %v3488_v13, %v1159_v60 }
 0x275   : > { %v1241_v43 = vpop.permute.xlu1 %1240 }
 0x279   : > { %v1239_v12 = vpop.permute.xlu0 %1238 }
 0x27a   : > { %v1503_v8 = vsel %vm1489_vm4, %v1470_v33, %v1239_v12 }
 0x27b   : > { %1852 = vmatmul.msk.bf16.gmra.mxu1 %vm1546_vm5, %v1503_v8 }
 0x281   : > { %v1222_v14 = vpop.permute.xlu0 %1221 }
 0x282   : > { %v1488_v59 = vsel %vm1456_vm3, %v1455_v10, %v1222_v14 }
 0x283   : > { %v1521_v61 = vsel %vm1489_vm4, %v1488_v59, %v1257_v47 }
 0x284   : > { %1861 = vmatmul.msk.bf16.gmra.mxu3 %vm1546_vm5, %v1521_v61 }
 0x286   : > { %v1632_v23 = vpop.f32.mrf.mxu2 }
 0x287   : > { %v1633_v3 = vadd.f32 %v3694_v28, %v1632_v23 }
 0x288   : > { %v1592_v20 = vpop.f32.mrf.mxu0 }
 0x289   : > { %v1593_v0 = vadd.f32 %v3694_v28, %v1592_v20  ;;  %1704 = vxpose.xlu0.b32.start [1/16] (narrow) %v1633_v3, 8  ;;  %v1206_v53 = vpop.permute.xlu0 %1205 }
 0x28a   : > { %v1472_v41 = vsel %vm1456_vm3, %v1439_v51, %v1206_v53 }
 0x28b   : > { %1672 = vxpose.xlu2.b32.start [1/16] (narrow) %v1593_v0, 8  ;;  %v1505_v32 = vsel %vm1489_vm4, %v1472_v41, %v1241_v43 }
 0x28c   : > { %1853 = vmatmul.msk.bf16.gmra.mxu1 %vm1546_vm5, %v1505_v32 }
 0x28e   : > { %v1634_v52 = vpop.f32.mrf.mxu2 }
 0x28f   : > { %v1635_v45 = vadd.f32 %v3694_v28, %v1634_v52 }
 0x290   : > { %v1594_v18 = vpop.f32.mrf.mxu0 }
 0x291   : > { %v1595_v24 = vadd.f32 %v3694_v28, %v1594_v18  ;;  %1705 = vxpose.xlu0.b32.cont [2/16] (narrow) %v1635_v45, 8 }
 0x293   : > { %1673 = vxpose.xlu2.b32.cont [2/16] (narrow) %v1595_v24, 8 }
 0x297   : > { %v1637_v13 = vpop.f32.mrf.mxu2 }
 0x298   : > { %v1638_v44 = vadd.f32 %v3694_v28, %v1637_v13 }
 0x29a   : > { %1706 = vxpose.xlu0.b32.cont [3/16] (narrow) %v1638_v44, 8 }
 0x29f   : > { %v1639_v22 = vpop.f32.mrf.mxu2 }
 0x2a0   : > { %v1640_v21 = vadd.f32 %v3694_v28, %v1639_v22  ;;  %v1597_v62 = vpop.f32.mrf.mxu0 }
 0x2a1   : > { %v1598_v49 = vadd.f32 %v3694_v28, %v1597_v62  ;;  %v1652_v2 = vpop.f32.mrf.mxu3 }
 0x2a2   : > { %1707 = vxpose.xlu0.b32.cont [4/16] (narrow) %v1640_v21, 8  ;;  %v1653_v4 = vadd.f32 %v3694_v28, %v1652_v2 }
 0x2a3   : > { %1674 = vxpose.xlu2.b32.cont [3/16] (narrow) %v1598_v49, 8 }
 0x2a8   : > { %v1599_v29 = vpop.f32.mrf.mxu0 }
 0x2a9   : > { %v1600_v25 = vadd.f32 %v3694_v28, %v1599_v29  ;;  %v1654_v27 = vpop.f32.mrf.mxu3 }
 0x2aa   : > { %v1612_v55 = vpop.f32.mrf.mxu1  ;;  %v1655_v6 = vadd.f32 %v3694_v28, %v1654_v27 }
 0x2ab   : > { %1675 = vxpose.xlu2.b32.cont [4/16] (narrow) %v1600_v25, 8  ;;  %v1613_v31 = vadd.f32 %v3694_v28, %v1612_v55 }
 0x2b2   : > { %v1614_v34 = vpop.f32.mrf.mxu1 }
 0x2b3   : > { %v1615_v17 = vadd.f32 %v3694_v28, %v1614_v34 }
 0x2be   : > { %v1642_v39 = vpop.f32.mrf.mxu2 }
 0x2bf   : > { %v1643_v56 = vadd.f32 %v3694_v28, %v1642_v39 }
 0x2c1   : > { %1708 = vxpose.xlu0.b32.cont [5/16] (narrow) %v1643_v56, 8  ;;  %v1602_v11 = vpop.f32.mrf.mxu0 }
 0x2c2   : > { %v1603_v35 = vadd.f32 %v3694_v28, %v1602_v11 }
 0x2c4   : > { %1676 = vxpose.xlu2.b32.cont [5/16] (narrow) %v1603_v35, 8 }
 0x2c6   : > { %v1644_v50 = vpop.f32.mrf.mxu2 }
 0x2c7   : > { %v1645_v15 = vadd.f32 %v3694_v28, %v1644_v50 }
 0x2c9   : > { %1709 = vxpose.xlu0.b32.cont [6/16] (narrow) %v1645_v15, 8  ;;  %v1604_v57 = vpop.f32.mrf.mxu0 }
 0x2ca   : > { %v1605_v9 = vadd.f32 %v3694_v28, %v1604_v57 }
 0x2cc   : > { %1677 = vxpose.xlu2.b32.cont [6/16] (narrow) %v1605_v9, 8 }
 0x2cf   : > { %v1657_v54 = vpop.f32.mrf.mxu3 }
 0x2d0   : > { %v1658_v30 = vadd.f32 %v3694_v28, %v1657_v54 }
 0x2d7   : > { %v1659_v7 = vpop.f32.mrf.mxu3 }
 0x2d8   : > { %v1617_v40 = vpop.f32.mrf.mxu1  ;;  %v1660_v58 = vadd.f32 %v3694_v28, %v1659_v7 }
 0x2d9   : > { %v1647_v37 = vpop.f32.mrf.mxu2  ;;  %v1618_v12 = vadd.f32 %v3694_v28, %v1617_v40 }
 0x2da   : > { %v1648_v1 = vadd.f32 %v3694_v28, %v1647_v37 }
 0x2dc   : > { %1710 = vxpose.xlu0.b32.cont [7/16] (narrow) %v1648_v1, 8 }
 0x2e0   : > { %v1619_v5 = vpop.f32.mrf.mxu1 }
 0x2e1   : > { %v1649_v42 = vpop.f32.mrf.mxu2  ;;  %v1620_v63 = vadd.f32 %v3694_v28, %v1619_v5 }
 0x2e2   : > { %v1650_v19 = vadd.f32 %v3694_v28, %v1649_v42  ;;  %v1607_v38 = vpop.f32.mrf.mxu0 }
 0x2e3   : > { %v1608_v46 = vadd.f32 %v3694_v28, %v1607_v38 }
 0x2e4   : > { %1711 = vxpose.xlu0.b32.cont [8/16] (narrow) %v1650_v19, 8 }
 0x2e5   : > { %1678 = vxpose.xlu2.b32.cont [7/16] (narrow) %v1608_v46, 8 }
 0x2ea   : > { %v1609_v16 = vpop.f32.mrf.mxu0 }
 0x2eb   : > { %v1610_v36 = vadd.f32 %v3694_v28, %v1609_v16 }
 0x2ec   : > { %1712 = vxpose.xlu0.b32.cont [9/16] (narrow) %v1653_v4, 8 }
 0x2ed   : > { %1679 = vxpose.xlu2.b32.cont [8/16] (narrow) %v1610_v36, 8 }
 0x2f4   : > { %1713 = vxpose.xlu0.b32.cont [10/16] (narrow) %v1655_v6, 8 }
 0x2f5   : > { %1680 = vxpose.xlu2.b32.cont [9/16] (narrow) %v1613_v31, 8 }
 0x2f6   : > { %v1662_v26 = vpop.f32.mrf.mxu3 }
 0x2f7   : > { %v1663_v33 = vadd.f32 %v3694_v28, %v1662_v26 }
 0x2f8   : > { %v1622_v8 = vpop.f32.mrf.mxu1 }
 0x2f9   : > { %v1623_v10 = vadd.f32 %v3694_v28, %v1622_v8 }
 0x2fc   : > { %1714 = vxpose.xlu0.b32.cont [11/16] (narrow) %v1658_v30, 8 }
 0x2fd   : > { %1681 = vxpose.xlu2.b32.cont [10/16] (narrow) %v1615_v17, 8 }
 0x2fe   : > { %v1664_v48 = vpop.f32.mrf.mxu3 }
 0x2ff   : > { %v1665_v47 = vadd.f32 %v3694_v28, %v1664_v48 }
 0x300   : > { %v1624_v14 = vpop.f32.mrf.mxu1 }
 0x301   : > { %v1625_v60 = vadd.f32 %v3694_v28, %v1624_v14 }
 0x304   : > { %1715 = vxpose.xlu0.b32.cont [12/16] (narrow) %v1660_v58, 8 }
 0x305   : > { %1682 = vxpose.xlu2.b32.cont [11/16] (narrow) %v1618_v12, 8 }
 0x307   : > { %v1667_v59 = vpop.f32.mrf.mxu3 }
 0x308   : > { %v1668_v61 = vadd.f32 %v3694_v28, %v1667_v59 }
 0x309   : > { %v1627_v23 = vpop.f32.mrf.mxu1 }
 0x30a   : > { %v1628_v43 = vadd.f32 %v3694_v28, %v1627_v23 }
 0x30c   : > { %1716 = vxpose.xlu0.b32.cont [13/16] (narrow) %v1663_v33, 8 }
 0x30d   : > { %1683 = vxpose.xlu2.b32.cont [12/16] (narrow) %v1620_v63, 8 }
 0x30f   : > { %v1669_v3 = vpop.f32.mrf.mxu3 }
 0x310   : > { %v1670_v20 = vadd.f32 %v3694_v28, %v1669_v3 }
 0x311   : > { %v1629_v51 = vpop.f32.mrf.mxu1 }
 0x312   : > { %v1630_v0 = vadd.f32 %v3694_v28, %v1629_v51 }
 0x314   : > { %1717 = vxpose.xlu0.b32.cont [14/16] (narrow) %v1665_v47, 8 }
 0x315   : > { %1684 = vxpose.xlu2.b32.cont [13/16] (narrow) %v1623_v10, 8 }
 0x31c   : > { %1718 = vxpose.xlu0.b32.cont [15/16] (narrow) %v1668_v61, 8 }
 0x31d   : > { %1685 = vxpose.xlu2.b32.cont [14/16] (narrow) %v1625_v60, 8 }
 0x324   : > { %1719 = vxpose.xlu0.b32.end [16/16] (narrow) %v1670_v20, 8 }
 0x325   : > { %1686 = vxpose.xlu2.b32.cont [15/16] (narrow) %v1628_v43, 8 }
 0x32d   : > { %1687 = vxpose.xlu2.b32.end [16/16] (narrow) %v1630_v0, 8 }
 0x34e   : > { %v1688_v53 = vpop.trf.xlu2 }
 0x34f   : > { %1736 = vst [vmem:[%s206_s16] sm:$0xff] %v1688_v53 }
 0x350   : > { %v1720_v41 = vpop.trf.xlu0 }
 0x351   : > { %1737 = vst [vmem:[%s206_s16 + $0x8] sm:$0xff] %v1720_v41 }
 0x352 PF: > { %s13_s14 = sadd.s32 1, %s2364_s14   ;;  %s3890_s12 = smov %s2360_s13 }
 0x353   : > { %p10_p5 = scmp.ge.s32.totalorder %s13_s14, 4   ;;  %s3891_s13 = smov %s3893_s15 }
 0x355   :  { %12 = sbr.rel (!%p10_p5) target bundleno = 2 (0x2), region = 62 }

</bundles_post_ra>
